<compile_context>
chip_gen: v7x
topology: tpu7x:2x2x1
jax: 0.10.0
libtpu: 0.0.40
codegen_flags: <defaults>
</compile_context>

<pallas_src>
import jax
import jax.numpy as jnp
from jax.experimental import pallas as pl
from jax.experimental.pallas import tpu as pltpu


# --------------------------------------------------------------------------
# Kernel body (shared by the plain and D-tiled paths; only block shapes differ)
# --------------------------------------------------------------------------
def _signal_cav_kernel(labels_ref, w_ref, b_ref, o_ref):
    # labels_ref: (TB, K), w_ref/b_ref: (K, TD), o_ref: (TB, K, TD)
    lab = labels_ref[...]                                    # (TB, K)
    w = w_ref[...]                                           # (K, TD)
    b = b_ref[...]                                           # (K, TD)
    out = lab[:, :, None] * w[None, :, :] + b[None, :, :]    # (TB, K, TD)
    o_ref[...] = out.astype(o_ref.dtype)


# --------------------------------------------------------------------------
# Generation-aware sizing helpers
# --------------------------------------------------------------------------
def _tpu_generation():
    """Best-effort TPU generation (5/6/7); 0 if unknown."""
    try:
        kind = jax.devices()[0].device_kind.lower()
    except Exception:  # pragma: no cover - e.g. no devices during tracing
        return 0
    if "v7" in kind or "7x" in kind:
        return 7
    if "v6" in kind or "trillium" in kind:
        return 6
    if "v5" in kind:
        return 5
    return 0


def _gen_params(gen):
    """(target_output_tile_bytes, vmem_cap_bytes, default_scoped_bytes, num_cores)."""
    if gen >= 7:
        # 64 MiB physical VMEM per TC; leave headroom -> cap ~48 MiB. 2 TCs.
        return (8 << 20, 48 << 20, 32 << 20, 2)
    if gen == 6:
        return (4 << 20, 100 << 20, 32 << 20, 1)
    if gen == 5:
        # v5e: default scoped VMEM limit is only 16 MiB.
        return (2 << 20, 100 << 20, 16 << 20, 1)
    # Unknown / older chips: conservative.
    return (2 << 20, 64 << 20, 16 << 20, 1)


def _working_set_bytes(tb, K, td, d_tiled, itemsize=4):
    out_b = 2 * tb * K * td * itemsize          # output tile, double-buffered
    lab_b = 2 * tb * K * itemsize               # labels tile, double-buffered
    # weights + biases: single-buffered (Buffered(1)) when resident; double
    # buffered when they are re-fetched per D-tile.
    wb_b = (4 if d_tiled else 2) * K * td * itemsize
    return out_b + lab_b + wb_b + (1 << 20)     # ~1 MiB headroom


def _choose_tiles(B, K, D, target_tile, vmem_cap, num_cores):
    """Pick (TB, TD). TB is a multiple of 8 or the full batch; TD is a multiple
    of 128 or the full D."""
    itemsize = 4

    def round_tb(tb):
        # Sublane-aligned batch tile, clamped to the full batch.
        return min(max(8, (tb // 8) * 8), B)

    # ---- preferred: no D-tiling, weights/biases fully resident --------------
    td = D
    tb = round_tb(max(1, target_tile // (K * D * itemsize)))

    if num_cores >= 2 and B >= 16:
        # At least 2 batch blocks so both TensorCores get work; make the block
        # count even so neither core idles.
        half_up = ((-(-B // 2)) + 7) // 8 * 8
        tb = min(tb, half_up)
        nb = -(-B // tb)
        if nb > 1 and nb % 2 == 1:
            for nb_try in (nb + 1, nb + 3):
                tb_try = round_tb(-(-B // nb_try))
                if (-(-B // tb_try)) % 2 == 0:
                    tb = tb_try
                    break

    # Shrink TB (never below 8 rows / the full batch) until it fits in VMEM.
    while _working_set_bytes(tb, K, td, False) > vmem_cap and tb > min(B, 8):
        tb = round_tb(tb // 2)

    if (_working_set_bytes(tb, K, td, False) <= vmem_cap
            or D % 128 != 0 or D <= 128):
        # TODO(synk): if it still does not fit and D % 128 != 0, a lane-padded
        # flattened (TB, K*D) layout / D-tiling would be needed.
        return tb, td

    # ---- very large K*D: add a lane-aligned D-tiling axis instead of
    # ---- dropping TB below the sublane size --------------------------------
    tb = min(B, 8)
    td = D
    while td > 128 and _working_set_bytes(tb, td, True) > vmem_cap:
        td = max(128, ((td // 2) + 127) // 128 * 128)
    # Grow TB back toward the target tile size now that TD is smaller.
    tb_big = round_tb(max(tb, target_tile // (K * td * itemsize)))
    while tb_big > tb and _working_set_bytes(tb_big, K, td, True) > vmem_cap:
        tb_big = round_tb(tb_big // 2)
    if _working_set_bytes(tb_big, K, td, True) <= vmem_cap:
        tb = max(tb, tb_big)
    return tb, td


# --------------------------------------------------------------------------
# Wrapper
# --------------------------------------------------------------------------
def signal_cav_forward(labels, weights, biases, *, tile_override=None):
    """labels: (B, K); weights, biases: (K, D). Returns (B, K, D)."""
    B, K = labels.shape
    Kw, D = weights.shape
    assert K == Kw and biases.shape == (K, D)

    gen = _tpu_generation()
    target_tile, vmem_cap, default_scoped, num_cores = _gen_params(gen)

    if tile_override is not None:
        TB, TD = tile_override
        TB = min(TB, B)
        TD = min(TD, D)
    else:
        TB, TD = _choose_tiles(B, K, D, target_tile, vmem_cap, num_cores)

    d_tiled = TD < D
    nb = pl.cdiv(B, TB)
    out_dtype = jnp.result_type(labels.dtype, weights.dtype, biases.dtype)

    vmem_needed = _working_set_bytes(TB, K, TD, d_tiled)
    # Always set the scoped-VMEM limit (v5e default is only 16 MiB); never
    # request more than the per-generation cap.
    vmem_limit = int(min(vmem_cap, max(vmem_needed, default_scoped)))

    if not d_tiled:
        grid = (nb,)
        in_specs = [
            pl.BlockSpec((TB, K), lambda i: (i, 0)),
            # Constant index map: DMA'd once, resident for the whole grid.
            # Single-buffered to save VMEM (matters most on v7x's 64 MiB VMEM
            # and v5e's 16 MiB default scoped limit).
            pl.BlockSpec((K, D), lambda i: (0, 0), pipeline_mode=pl.Buffered(1)),
            pl.BlockSpec((K, D), lambda i: (0, 0), pipeline_mode=pl.Buffered(1)),
        ]
        out_specs = pl.BlockSpec((TB, K, D), lambda i: (i, 0, 0))
        dim_sem = ("parallel",)
    else:
        nd = pl.cdiv(D, TD)
        grid = (nb, nd)
        in_specs = [
            pl.BlockSpec((TB, K), lambda i, j: (i, 0)),
            pl.BlockSpec((K, TD), lambda i, j: (0, j)),
            pl.BlockSpec((K, TD), lambda i, j: (0, j)),
        ]
        out_specs = pl.BlockSpec((TB, K, TD), lambda i, j: (i, 0, j))
        dim_sem = ("parallel", "parallel")

    # Ragged last block along the batch axis: out-of-bounds rows are masked on
    # writeback, so no padding and no post-kernel slice is needed.
    return pl.pallas_call(
        _signal_cav_kernel,
        out_shape=jax.ShapeDtypeStruct((B, K, D), out_dtype),
        grid=grid,
        in_specs=in_specs,
        out_specs=out_specs,
        compiler_params=pltpu.CompilerParams(
            dimension_semantics=dim_sem,
            vmem_limit_bytes=vmem_limit,
        ),
    )(labels, weights, biases)


# --------------------------------------------------------------------------
# Demo / correctness check
# --------------------------------------------------------------------------
if __name__ == "__main__":
    key = jax.random.PRNGKey(0)
    k_cavs, k_b, k_lab = jax.random.split(key, 3)

    def ref_fwd(labels, w, b):
        return labels[:, :, None] * w[None, :, :] + b[None, :, :]

    # Primary config: K=8 concepts (CAVs), D=128 features (lane-dense output).
    K, D = 8, 128
    cavs = jax.random.normal(k_cavs, (K, D), dtype=jnp.float32)   # -> weights (1,K,D)
    b = jax.random.normal(k_b, (K, D), dtype=jnp.float32)         # -> biases  (1,K,D)

    # B=256: evenly tiled; B=37: ragged last block; B=4: full-batch tile < 8.
    for B in (256, 37, 4):
        k_lab, sub = jax.random.split(k_lab)
        labels = jax.random.normal(sub, (B, K), dtype=jnp.float32)
        out = jax.block_until_ready(signal_cav_forward(labels, cavs, b))
        assert out.shape == (B, K, D)
        assert jnp.allclose(out, ref_fwd(labels, cavs, b), atol=1e-6, rtol=1e-6), (
            f"mismatch at B={B}")

    # Exercise the D-tiled path (normally used when K*D is too large for VMEM)
    # on a small shape by forcing the tile sizes.
    K2, D2, B2 = 8, 256, 16
    k_lab, s1, s2, s3 = jax.random.split(k_lab, 4)
    cavs2 = jax.random.normal(s1, (K2, D2), dtype=jnp.float32)
    b2 = jax.random.normal(s2, (K2, D2), dtype=jnp.float32)
    labels2 = jax.random.normal(s3, (B2, K2), dtype=jnp.float32)
    out2 = jax.block_until_ready(
        signal_cav_forward(labels2, cavs2, b2, tile_override=(8, 128)))
    assert out2.shape == (B2, K2, D2)
    assert jnp.allclose(out2, ref_fwd(labels2, cavs2, b2), atol=1e-6, rtol=1e-6)

    # TODO(synk): train_step/val_step losses (MSE + Frobenius orthogonality),
    # get_direction/get_params/save_state_dict are training / host-side code,
    # not part of forward; intentionally not implemented as kernels.
    print("KERNEL_OK")
</pallas_src>

<mosaic_0001>
module attributes {stable_mosaic.version = 11 : i64} {
  func.func @_signal_cav_kernel(%arg0: i32, %arg1: memref<256x8xf32, #tpu.memory_space<vmem>>, %arg2: memref<8x128xf32, #tpu.memory_space<vmem>>, %arg3: memref<8x128xf32, #tpu.memory_space<vmem>>, %arg4: memref<256x8x128xf32, #tpu.memory_space<vmem>>) attributes {dimension_semantics = [#tpu.dimension_semantics<parallel>], iteration_bounds = array<i64: 1>, scalar_prefetch = 0 : i64, scratch_operands = 0 : i64, tpu.core_type = #tpu.core_type<tc>, window_params = [{transform_indices = @transform_0, window_bounds = array<i64: 256, 8>}, {pipeline_mode = #tpu.pipeline_mode<synchronous>, transform_indices = @transform_1, window_bounds = array<i64: 8, 128>}, {pipeline_mode = #tpu.pipeline_mode<synchronous>, transform_indices = @transform_2, window_bounds = array<i64: 8, 128>}, {transform_indices = @transform_3, window_bounds = array<i64: 256, 8, 128>}]} {
    %c0 = arith.constant 0 : index
    %c0_0 = arith.constant 0 : index
    %0 = vector.load %arg1[%c0, %c0_0] : memref<256x8xf32, #tpu.memory_space<vmem>>, vector<256x8xf32>
    %c0_1 = arith.constant 0 : index
    %c0_2 = arith.constant 0 : index
    %1 = vector.load %arg2[%c0_1, %c0_2] : memref<8x128xf32, #tpu.memory_space<vmem>>, vector<8x128xf32>
    %c0_3 = arith.constant 0 : index
    %c0_4 = arith.constant 0 : index
    %2 = vector.load %arg3[%c0_3, %c0_4] : memref<8x128xf32, #tpu.memory_space<vmem>>, vector<8x128xf32>
    %3 = vector.shape_cast %0 : vector<256x8xf32> to vector<256x8x1xf32>
    %4 = vector.shape_cast %1 : vector<8x128xf32> to vector<1x8x128xf32>
    %5 = vector.broadcast %3 : vector<256x8x1xf32> to vector<256x8x128xf32>
    %6 = vector.broadcast %4 : vector<1x8x128xf32> to vector<256x8x128xf32>
    %7 = arith.mulf %5, %6 : vector<256x8x128xf32>
    %8 = vector.shape_cast %2 : vector<8x128xf32> to vector<1x8x128xf32>
    %9 = vector.broadcast %8 : vector<1x8x128xf32> to vector<256x8x128xf32>
    %10 = arith.addf %7, %9 : vector<256x8x128xf32>
    %c0_5 = arith.constant 0 : index
    %c0_6 = arith.constant 0 : index
    %c0_7 = arith.constant 0 : index
    %11 = vector.load %arg4[%c0_5, %c0_6, %c0_7] : memref<256x8x128xf32, #tpu.memory_space<vmem>>, vector<256x8x128xf32>
    tpu.vector_store %arg4[%c0_5, %c0_6, %c0_7], %10 {strides = array<i32>} : memref<256x8x128xf32, #tpu.memory_space<vmem>>, vector<256x8x128xf32>,
    return
  }
  func.func @transform_0(%arg0: i32) -> (i32, i32) {
    %c0_i32 = arith.constant 0 : i32
    %c0_i32_0 = arith.constant 0 : i32
    return %arg0, %c0_i32 : i32, i32
  }
  func.func @transform_1(%arg0: i32) -> (i32, i32) {
    %c0_i32 = arith.constant 0 : i32
    %c0_i32_0 = arith.constant 0 : i32
    %c0_i32_1 = arith.constant 0 : i32
    return %c0_i32, %c0_i32_0 : i32, i32
  }
  func.func @transform_2(%arg0: i32) -> (i32, i32) {
    %c0_i32 = arith.constant 0 : i32
    %c0_i32_0 = arith.constant 0 : i32
    %c0_i32_1 = arith.constant 0 : i32
    return %c0_i32, %c0_i32_0 : i32, i32
  }
  func.func @transform_3(%arg0: i32) -> (i32, i32, i32) {
    %c0_i32 = arith.constant 0 : i32
    %c0_i32_0 = arith.constant 0 : i32
    %c0_i32_1 = arith.constant 0 : i32
    return %arg0, %c0_i32, %c0_i32_0 : i32, i32, i32
  }
}

</mosaic_0001>

<bundles_post_ra>
// kernel: tpu_custom_call.1
= control target key start
LH: loop header
LB: loop body
LE: loop exit
PB: predicated region body
PF: predicated region fallthrough
CT: control target
= control target key end

     0   :  { %v49_v0 = vlaneseq  ;;  %s3601_s0 = inlined_call_operand.vmem [shape: f32[256,8], index: 0, kind: input, shape index: {}]   ;;  %s3602_s1 = inlined_call_operand.vmem [shape: f32[8,128], index: 1, kind: input, shape index: {}]   ;;  %s3603_s2 = inlined_call_operand.vmem [shape: f32[8,128], index: 2, kind: input, shape index: {}]   ;;  %s3604_s3 = inlined_call_operand.hbm [shape: f32[256,8,128], index: 3, kind: output, shape index: {}]  }
   0x1   :  { %v15_v2 = vld [vmem:[%s3601_s0] sm:$0xff] }
   0x2   :  { %v50_v1 = vshrl.u32 %v49_v0, 7 }
   0x3   :  { %8 = vsyncpa [#allocation3], 0  ;;  %v16_v19 = vld [vmem:[%s3601_s0 + $0x8] sm:$0xff]  ;;  %v17_v28 = vld [vmem:[%s3601_s0 + $0x10] sm:$0xff] }
   0x4   :  { %v2682_v3 = vsub.s32 2, %v50_v1  ;;  %v2684_v4 = vsub.s32 0, %v50_v1  ;;  %v2686_v5 = vsub.s32 3, %v50_v1  ;;  %v2688_v6 = vsub.s32 1, %v50_v1  ;;  %v18_v37 = vld [vmem:[%s3601_s0 + $0x18] sm:$0xff]  ;;  %v19_v46 = vld [vmem:[%s3601_s0 + $0x20] sm:$0xff] }
   0x5   :  { %v2694_v11 = vsub.s32 5, %v50_v1  ;;  %v2696_v12 = vsub.s32 4, %v50_v1  ;;  %v2700_v15 = vsub.s32 7, %v50_v1  ;;  %v2702_v16 = vsub.s32 6, %v50_v1  ;;  %v20_v55 = vld [vmem:[%s3601_s0 + $0x28] sm:$0xff]  ;;  %v21_v0 = vld [vmem:[%s3601_s0 + $0x30] sm:$0xff] }
   0x6   :  { %v66_v7 = vrot.slane %v15_v2, %v2682_v3  ;;  %v52_v8 = vrot.slane %v15_v2, %v2684_v4  ;;  %v73_v9 = vrot.slane %v15_v2, %v2686_v5  ;;  %v59_v10 = vrot.slane %v15_v2, %v2688_v6 }
   0x7   :  { %v87_v13 = vrot.slane %v15_v2, %v2694_v11  ;;  %v80_v14 = vrot.slane %v15_v2, %v2696_v12  ;;  %v101_v17 = vrot.slane %v15_v2, %v2700_v15  ;;  %v94_v18 = vrot.slane %v15_v2, %v2702_v16 }
   0x8   :  { %68 = vbcast.lane.b32.xlu1 %v66_v7, 256  ;;  %54 = vbcast.lane.b32.xlu0 %v52_v8, 256  ;;  %v115_v20 = vrot.slane %v16_v19, %v2688_v6  ;;  %v108_v21 = vrot.slane %v16_v19, %v2684_v4  ;;  %v129_v22 = vrot.slane %v16_v19, %v2686_v5 }
   0x9   :  { %v122_v23 = vrot.slane %v16_v19, %v2682_v3  ;;  %v143_v24 = vrot.slane %v16_v19, %v2694_v11  ;;  %v136_v25 = vrot.slane %v16_v19, %v2696_v12  ;;  %v157_v26 = vrot.slane %v16_v19, %v2700_v15 }
   0xa   :  { %v150_v27 = vrot.slane %v16_v19, %v2702_v16  ;;  %v171_v29 = vrot.slane %v17_v28, %v2688_v6  ;;  %v164_v30 = vrot.slane %v17_v28, %v2684_v4  ;;  %v185_v31 = vrot.slane %v17_v28, %v2686_v5 }
   0xb   :  { %v178_v32 = vrot.slane %v17_v28, %v2682_v3  ;;  %v199_v33 = vrot.slane %v17_v28, %v2694_v11  ;;  %v192_v34 = vrot.slane %v17_v28, %v2696_v12  ;;  %v213_v35 = vrot.slane %v17_v28, %v2700_v15 }
   0xc   :  { %75 = vbcast.lane.b32.xlu1 %v73_v9, 256  ;;  %61 = vbcast.lane.b32.xlu0 %v59_v10, 256  ;;  %v206_v36 = vrot.slane %v17_v28, %v2702_v16  ;;  %v227_v38 = vrot.slane %v18_v37, %v2688_v6  ;;  %v220_v39 = vrot.slane %v18_v37, %v2684_v4 }
   0xd   :  { %v241_v40 = vrot.slane %v18_v37, %v2686_v5  ;;  %v234_v41 = vrot.slane %v18_v37, %v2682_v3  ;;  %v255_v42 = vrot.slane %v18_v37, %v2694_v11  ;;  %v248_v43 = vrot.slane %v18_v37, %v2696_v12 }
   0xe   :  { %v269_v44 = vrot.slane %v18_v37, %v2700_v15  ;;  %v262_v45 = vrot.slane %v18_v37, %v2702_v16  ;;  %v283_v47 = vrot.slane %v19_v46, %v2688_v6  ;;  %v276_v48 = vrot.slane %v19_v46, %v2684_v4 }
   0xf   :  { %v297_v49 = vrot.slane %v19_v46, %v2686_v5  ;;  %v290_v50 = vrot.slane %v19_v46, %v2682_v3  ;;  %v311_v51 = vrot.slane %v19_v46, %v2694_v11  ;;  %v304_v52 = vrot.slane %v19_v46, %v2696_v12 }
  0x10   :  { %89 = vbcast.lane.b32.xlu1 %v87_v13, 256  ;;  %82 = vbcast.lane.b32.xlu0 %v80_v14, 256  ;;  %v325_v53 = vrot.slane %v19_v46, %v2700_v15  ;;  %v318_v54 = vrot.slane %v19_v46, %v2702_v16  ;;  %v339_v56 = vrot.slane %v20_v55, %v2688_v6 }
  0x11   :  { %v332_v57 = vrot.slane %v20_v55, %v2684_v4  ;;  %v353_v58 = vrot.slane %v20_v55, %v2686_v5  ;;  %v346_v59 = vrot.slane %v20_v55, %v2682_v3  ;;  %v367_v60 = vrot.slane %v20_v55, %v2694_v11 }
  0x12   :  { %v360_v61 = vrot.slane %v20_v55, %v2696_v12  ;;  %v381_v62 = vrot.slane %v20_v55, %v2700_v15  ;;  %v374_v63 = vrot.slane %v20_v55, %v2702_v16  ;;  %v395_v1 = vrot.slane %v21_v0, %v2688_v6 }
  0x13   :  { %v388_v2 = vrot.slane %v21_v0, %v2684_v4  ;;  %v409_v7 = vrot.slane %v21_v0, %v2686_v5  ;;  %v402_v8 = vrot.slane %v21_v0, %v2682_v3  ;;  %v423_v9 = vrot.slane %v21_v0, %v2694_v11 }
  0x14   :  { %103 = vbcast.lane.b32.xlu1 %v101_v17, 256  ;;  %96 = vbcast.lane.b32.xlu0 %v94_v18, 256  ;;  %v416_v10 = vrot.slane %v21_v0, %v2696_v12  ;;  %v437_v13 = vrot.slane %v21_v0, %v2700_v15  ;;  %v430_v14 = vrot.slane %v21_v0, %v2702_v16  ;;  %v22_v17 = vld [vmem:[%s3601_s0 + $0x38] sm:$0xff] }
  0x15   :  { %v451_v18 = vrot.slane %v22_v17, %v2688_v6  ;;  %v444_v19 = vrot.slane %v22_v17, %v2684_v4  ;;  %v479_v28 = vrot.slane %v22_v17, %v2694_v11  ;;  %v486_v37 = vrot.slane %v22_v17, %v2702_v16 }
  0x18   :  { %117 = vbcast.lane.b32.xlu1 %v115_v20, 256  ;;  %110 = vbcast.lane.b32.xlu0 %v108_v21, 256  ;;  %v2780_v20 = vld [vmem:[%s3602_s1] sm:$0xff]  ;;  %v465_v21 = vrot.slane %v22_v17, %v2686_v5 }
  0x1c   :  { %131 = vbcast.lane.b32.xlu1 %v129_v22, 256  ;;  %124 = vbcast.lane.b32.xlu0 %v122_v23, 256  ;;  %v458_v22 = vrot.slane %v22_v17, %v2682_v3  ;;  %v2787_v23 = vld [vmem:[%s3603_s2] sm:$0xff] }
  0x20   :  { %145 = vbcast.lane.b32.xlu1 %v143_v24, 256  ;;  %138 = vbcast.lane.b32.xlu0 %v136_v25, 256 }
  0x24   :  { %159 = vbcast.lane.b32.xlu1 %v157_v26, 256  ;;  %152 = vbcast.lane.b32.xlu0 %v150_v27, 256 }
  0x28   :  { %173 = vbcast.lane.b32.xlu1 %v171_v29, 256  ;;  %166 = vbcast.lane.b32.xlu0 %v164_v30, 256  ;;  %v472_v29 = vrot.slane %v22_v17, %v2696_v12 }
  0x2c   :  { %187 = vbcast.lane.b32.xlu1 %v185_v31, 256  ;;  %180 = vbcast.lane.b32.xlu0 %v178_v32, 256 }
  0x30   :  { %201 = vbcast.lane.b32.xlu1 %v199_v33, 256  ;;  %194 = vbcast.lane.b32.xlu0 %v192_v34, 256 }
  0x34   :  { %215 = vbcast.lane.b32.xlu1 %v213_v35, 256  ;;  %208 = vbcast.lane.b32.xlu0 %v206_v36, 256  ;;  %v493_v36 = vrot.slane %v22_v17, %v2700_v15  ;;  %v24_v17 = vld [vmem:[%s3601_s0 + $0x48] sm:$0xff] }
  0x38   :  { %229 = vbcast.lane.b32.xlu1 %v227_v38, 256  ;;  %222 = vbcast.lane.b32.xlu0 %v220_v39, 256 }
  0x3c   :  { %243 = vbcast.lane.b32.xlu1 %v241_v40, 256  ;;  %236 = vbcast.lane.b32.xlu0 %v234_v41, 256  ;;  %v23_v40 = vld [vmem:[%s3601_s0 + $0x40] sm:$0xff] }
  0x3d   :  { %v500_v46 = vrot.slane %v23_v40, %v2684_v4 }
  0x40   :  { %257 = vbcast.lane.b32.xlu1 %v255_v42, 256  ;;  %250 = vbcast.lane.b32.xlu0 %v248_v43, 256 }
  0x44   :  { %271 = vbcast.lane.b32.xlu1 %v269_v44, 256  ;;  %264 = vbcast.lane.b32.xlu0 %v262_v45, 256  ;;  %v507_v45 = vrot.slane %v23_v40, %v2688_v6 }
  0x48   :  { %285 = vbcast.lane.b32.xlu1 %v283_v47, 256  ;;  %278 = vbcast.lane.b32.xlu0 %v276_v48, 256 }
  0x4c   :  { %299 = vbcast.lane.b32.xlu1 %v297_v49, 256  ;;  %292 = vbcast.lane.b32.xlu0 %v290_v50, 256 }
  0x50   :  { %313 = vbcast.lane.b32.xlu1 %v311_v51, 256  ;;  %306 = vbcast.lane.b32.xlu0 %v304_v52, 256 }
  0x54   :  { %327 = vbcast.lane.b32.xlu1 %v325_v53, 256  ;;  %320 = vbcast.lane.b32.xlu0 %v318_v54, 256  ;;  %v521_v53 = vrot.slane %v23_v40, %v2686_v5  ;;  %v514_v54 = vrot.slane %v23_v40, %v2682_v3 }
  0x58   :  { %341 = vbcast.lane.b32.xlu1 %v339_v56, 256  ;;  %334 = vbcast.lane.b32.xlu0 %v332_v57, 256 }
  0x5c   :  { %355 = vbcast.lane.b32.xlu1 %v353_v58, 256  ;;  %348 = vbcast.lane.b32.xlu0 %v346_v59, 256 }
  0x60   :  { %369 = vbcast.lane.b32.xlu1 %v367_v60, 256  ;;  %362 = vbcast.lane.b32.xlu0 %v360_v61, 256  ;;  %v535_v61 = vrot.slane %v23_v40, %v2694_v11 }
  0x64   :  { %383 = vbcast.lane.b32.xlu1 %v381_v62, 256  ;;  %376 = vbcast.lane.b32.xlu0 %v374_v63, 256  ;;  %v528_v62 = vrot.slane %v23_v40, %v2696_v12 }
  0x68   :  { %397 = vbcast.lane.b32.xlu1 %v395_v1, 256  ;;  %390 = vbcast.lane.b32.xlu0 %v388_v2, 256 }
  0x6c   :  { %411 = vbcast.lane.b32.xlu1 %v409_v7, 256  ;;  %404 = vbcast.lane.b32.xlu0 %v402_v8, 256 }
  0x70   :  { %425 = vbcast.lane.b32.xlu1 %v423_v9, 256  ;;  %418 = vbcast.lane.b32.xlu0 %v416_v10, 256  ;;  %v549_v9 = vrot.slane %v23_v40, %v2700_v15  ;;  %v542_v10 = vrot.slane %v23_v40, %v2702_v16  ;;  %v591_v40 = vrot.slane %v24_v17, %v2694_v11 }
  0x74   :  { %439 = vbcast.lane.b32.xlu1 %v437_v13, 256  ;;  %432 = vbcast.lane.b32.xlu0 %v430_v14, 256 }
  0x78   :  { %453 = vbcast.lane.b32.xlu1 %v451_v18, 256  ;;  %446 = vbcast.lane.b32.xlu0 %v444_v19, 256 }
  0x7a   :  { %v69_v24 = vpop.permute.xlu1 %68  ;;  %v55_v25 = vpop.permute.xlu0 %54 }
  0x7b   :  { %v1843_v26 = vmul.f32 %v69_v24, %v2780_v20  ;;  %v1841_v27 = vmul.f32 %v55_v25, %v2780_v20  ;;  %v563_v24 = vrot.slane %v24_v17, %v2688_v6  ;;  %v556_v25 = vrot.slane %v24_v17, %v2684_v4 }
  0x7c   :  { %467 = vbcast.lane.b32.xlu1 %v465_v21, 256  ;;  %460 = vbcast.lane.b32.xlu0 %v458_v22, 256 }
  0x7d   :  { %v2099_v30 = vadd.f32 %v1843_v26, %v2787_v23  ;;  %v2097_v31 = vadd.f32 %v1841_v27, %v2787_v23 }
  0x7e   :  { %v76_v32 = vpop.permute.xlu1 %75  ;;  %v62_v33 = vpop.permute.xlu0 %61 }
  0x7f   :  { %2355 = vst [vmem:[#allocation2 + $0x10] sm:$0xff] %v2099_v30  ;;  %2353 = vst [vmem:[#allocation2] sm:$0xff] %v2097_v31  ;;  %v1844_v34 = vmul.f32 %v76_v32, %v2780_v20  ;;  %v1842_v35 = vmul.f32 %v62_v33, %v2780_v20  ;;  %v577_v32 = vrot.slane %v24_v17, %v2686_v5 }
  0x80   :  { %481 = vbcast.lane.b32.xlu1 %v479_v28, 256  ;;  %474 = vbcast.lane.b32.xlu0 %v472_v29, 256  ;;  %v570_v33 = vrot.slane %v24_v17, %v2682_v3 }
  0x81   :  { %v2100_v38 = vadd.f32 %v1844_v34, %v2787_v23  ;;  %v2098_v39 = vadd.f32 %v1842_v35, %v2787_v23 }
  0x82   :  { %v90_v41 = vpop.permute.xlu1 %89  ;;  %v83_v42 = vpop.permute.xlu0 %82 }
  0x83   :  { %2356 = vst [vmem:[#allocation2 + $0x18] sm:$0xff] %v2100_v38  ;;  %2354 = vst [vmem:[#allocation2 + $0x8] sm:$0xff] %v2098_v39  ;;  %v1846_v43 = vmul.f32 %v90_v41, %v2780_v20  ;;  %v1845_v44 = vmul.f32 %v83_v42, %v2780_v20  ;;  %v584_v41 = vrot.slane %v24_v17, %v2696_v12 }
  0x84   :  { %495 = vbcast.lane.b32.xlu1 %v493_v36, 256  ;;  %488 = vbcast.lane.b32.xlu0 %v486_v37, 256 }
  0x85   :  { %v2102_v47 = vadd.f32 %v1846_v43, %v2787_v23  ;;  %v2101_v48 = vadd.f32 %v1845_v44, %v2787_v23 }
  0x86   :  { %v104_v49 = vpop.permute.xlu1 %103  ;;  %v97_v50 = vpop.permute.xlu0 %96 }
  0x87   :  { %2358 = vst [vmem:[#allocation2 + $0x28] sm:$0xff] %v2102_v47  ;;  %2357 = vst [vmem:[#allocation2 + $0x20] sm:$0xff] %v2101_v48  ;;  %v1848_v51 = vmul.f32 %v104_v49, %v2780_v20  ;;  %v1847_v52 = vmul.f32 %v97_v50, %v2780_v20  ;;  %v605_v48 = vrot.slane %v24_v17, %v2700_v15 }
  0x88   :  { %509 = vbcast.lane.b32.xlu1 %v507_v45, 256  ;;  %502 = vbcast.lane.b32.xlu0 %v500_v46, 256  ;;  %v598_v49 = vrot.slane %v24_v17, %v2702_v16 }
  0x89   :  { %v2104_v55 = vadd.f32 %v1848_v51, %v2787_v23  ;;  %v2103_v56 = vadd.f32 %v1847_v52, %v2787_v23  ;;  %v25_v52 = vld [vmem:[%s3601_s0 + $0x50] sm:$0xff] }
  0x8a   :  { %v118_v57 = vpop.permute.xlu1 %117  ;;  %v111_v58 = vpop.permute.xlu0 %110  ;;  %v647_v17 = vrot.slane %v25_v52, %v2694_v11 }
  0x8b   :  { %2360 = vst [vmem:[#allocation2 + $0x38] sm:$0xff] %v2104_v55  ;;  %2359 = vst [vmem:[#allocation2 + $0x30] sm:$0xff] %v2103_v56  ;;  %v1850_v59 = vmul.f32 %v118_v57, %v2780_v20  ;;  %v1849_v60 = vmul.f32 %v111_v58, %v2780_v20  ;;  %v619_v57 = vrot.slane %v25_v52, %v2688_v6 }
  0x8c   :  { %523 = vbcast.lane.b32.xlu1 %v521_v53, 256  ;;  %516 = vbcast.lane.b32.xlu0 %v514_v54, 256  ;;  %v612_v58 = vrot.slane %v25_v52, %v2684_v4 }
  0x8d   :  { %v2106_v63 = vadd.f32 %v1850_v59, %v2787_v23  ;;  %v2105_v0 = vadd.f32 %v1849_v60, %v2787_v23 }
  0x8e   :  { %v132_v1 = vpop.permute.xlu1 %131  ;;  %v125_v2 = vpop.permute.xlu0 %124 }
  0x8f   :  { %2362 = vst [vmem:[#allocation2 + $0x48] sm:$0xff] %v2106_v63  ;;  %2361 = vst [vmem:[#allocation2 + $0x40] sm:$0xff] %v2105_v0  ;;  %v1852_v7 = vmul.f32 %v132_v1, %v2780_v20  ;;  %v1851_v8 = vmul.f32 %v125_v2, %v2780_v20  ;;  %v633_v1 = vrot.slane %v25_v52, %v2686_v5 }
  0x90   :  { %537 = vbcast.lane.b32.xlu1 %v535_v61, 256  ;;  %530 = vbcast.lane.b32.xlu0 %v528_v62, 256  ;;  %v626_v2 = vrot.slane %v25_v52, %v2682_v3 }
  0x91   :  { %v2108_v13 = vadd.f32 %v1852_v7, %v2787_v23  ;;  %v2107_v14 = vadd.f32 %v1851_v8, %v2787_v23 }
  0x92   :  { %v146_v18 = vpop.permute.xlu1 %145  ;;  %v139_v19 = vpop.permute.xlu0 %138 }
  0x93   :  { %2364 = vst [vmem:[#allocation2 + $0x58] sm:$0xff] %v2108_v13  ;;  %2363 = vst [vmem:[#allocation2 + $0x50] sm:$0xff] %v2107_v14  ;;  %v1854_v21 = vmul.f32 %v146_v18, %v2780_v20  ;;  %v1853_v22 = vmul.f32 %v139_v19, %v2780_v20  ;;  %v640_v18 = vrot.slane %v25_v52, %v2696_v12 }
  0x94   :  { %551 = vbcast.lane.b32.xlu1 %v549_v9, 256  ;;  %544 = vbcast.lane.b32.xlu0 %v542_v10, 256 }
  0x95   :  { %v2110_v26 = vadd.f32 %v1854_v21, %v2787_v23  ;;  %v2109_v27 = vadd.f32 %v1853_v22, %v2787_v23 }
  0x96   :  { %v160_v28 = vpop.permute.xlu1 %159  ;;  %v153_v29 = vpop.permute.xlu0 %152 }
  0x97   :  { %2366 = vst [vmem:[#allocation2 + $0x68] sm:$0xff] %v2110_v26  ;;  %2365 = vst [vmem:[#allocation2 + $0x60] sm:$0xff] %v2109_v27  ;;  %v1856_v30 = vmul.f32 %v160_v28, %v2780_v20  ;;  %v1855_v31 = vmul.f32 %v153_v29, %v2780_v20  ;;  %v661_v27 = vrot.slane %v25_v52, %v2700_v15 }
  0x98   :  { %565 = vbcast.lane.b32.xlu1 %v563_v24, 256  ;;  %558 = vbcast.lane.b32.xlu0 %v556_v25, 256  ;;  %v654_v28 = vrot.slane %v25_v52, %v2702_v16 }
  0x99   :  { %v2112_v34 = vadd.f32 %v1856_v30, %v2787_v23  ;;  %v2111_v35 = vadd.f32 %v1855_v31, %v2787_v23  ;;  %v26_v31 = vld [vmem:[%s3601_s0 + $0x58] sm:$0xff] }
  0x9a   :  { %v174_v36 = vpop.permute.xlu1 %173  ;;  %v167_v37 = vpop.permute.xlu0 %166  ;;  %v703_v52 = vrot.slane %v26_v31, %v2694_v11 }
  0x9b   :  { %2368 = vst [vmem:[#allocation2 + $0x78] sm:$0xff] %v2112_v34  ;;  %2367 = vst [vmem:[#allocation2 + $0x70] sm:$0xff] %v2111_v35  ;;  %v1858_v38 = vmul.f32 %v174_v36, %v2780_v20  ;;  %v1857_v39 = vmul.f32 %v167_v37, %v2780_v20  ;;  %v675_v36 = vrot.slane %v26_v31, %v2688_v6 }
  0x9c   :  { %579 = vbcast.lane.b32.xlu1 %v577_v32, 256  ;;  %572 = vbcast.lane.b32.xlu0 %v570_v33, 256  ;;  %v668_v37 = vrot.slane %v26_v31, %v2684_v4 }
  0x9d   :  { %v2114_v42 = vadd.f32 %v1858_v38, %v2787_v23  ;;  %v2113_v43 = vadd.f32 %v1857_v39, %v2787_v23 }
  0x9e   :  { %v188_v44 = vpop.permute.xlu1 %187  ;;  %v181_v45 = vpop.permute.xlu0 %180 }
  0x9f   :  { %2370 = vst [vmem:[#allocation2 + $0x88] sm:$0xff] %v2114_v42  ;;  %2369 = vst [vmem:[#allocation2 + $0x80] sm:$0xff] %v2113_v43  ;;  %v1860_v46 = vmul.f32 %v188_v44, %v2780_v20  ;;  %v1859_v47 = vmul.f32 %v181_v45, %v2780_v20  ;;  %v689_v44 = vrot.slane %v26_v31, %v2686_v5 }
  0xa0   :  { %593 = vbcast.lane.b32.xlu1 %v591_v40, 256  ;;  %586 = vbcast.lane.b32.xlu0 %v584_v41, 256  ;;  %v682_v45 = vrot.slane %v26_v31, %v2682_v3 }
  0xa1   :  { %v2116_v50 = vadd.f32 %v1860_v46, %v2787_v23  ;;  %v2115_v51 = vadd.f32 %v1859_v47, %v2787_v23 }
  0xa2   :  { %v202_v53 = vpop.permute.xlu1 %201  ;;  %v195_v54 = vpop.permute.xlu0 %194 }
  0xa3   :  { %2372 = vst [vmem:[#allocation2 + $0x98] sm:$0xff] %v2116_v50  ;;  %2371 = vst [vmem:[#allocation2 + $0x90] sm:$0xff] %v2115_v51  ;;  %v1862_v55 = vmul.f32 %v202_v53, %v2780_v20  ;;  %v1861_v56 = vmul.f32 %v195_v54, %v2780_v20  ;;  %v696_v53 = vrot.slane %v26_v31, %v2696_v12 }
  0xa4   :  { %607 = vbcast.lane.b32.xlu1 %v605_v48, 256  ;;  %600 = vbcast.lane.b32.xlu0 %v598_v49, 256 }
  0xa5   :  { %v2118_v59 = vadd.f32 %v1862_v55, %v2787_v23  ;;  %v2117_v60 = vadd.f32 %v1861_v56, %v2787_v23 }
  0xa6   :  { %v216_v61 = vpop.permute.xlu1 %215  ;;  %v209_v62 = vpop.permute.xlu0 %208 }
  0xa7   :  { %2374 = vst [vmem:[#allocation2 + $0xa8] sm:$0xff] %v2118_v59  ;;  %2373 = vst [vmem:[#allocation2 + $0xa0] sm:$0xff] %v2117_v60  ;;  %v1864_v63 = vmul.f32 %v216_v61, %v2780_v20  ;;  %v1863_v0 = vmul.f32 %v209_v62, %v2780_v20  ;;  %v717_v60 = vrot.slane %v26_v31, %v2700_v15 }
  0xa8   :  { %621 = vbcast.lane.b32.xlu1 %v619_v57, 256  ;;  %614 = vbcast.lane.b32.xlu0 %v612_v58, 256  ;;  %v710_v61 = vrot.slane %v26_v31, %v2702_v16 }
  0xa9   :  { %v2120_v7 = vadd.f32 %v1864_v63, %v2787_v23  ;;  %v2119_v8 = vadd.f32 %v1863_v0, %v2787_v23  ;;  %v27_v0 = vld [vmem:[%s3601_s0 + $0x60] sm:$0xff] }
  0xaa   :  { %v230_v9 = vpop.permute.xlu1 %229  ;;  %v223_v10 = vpop.permute.xlu0 %222  ;;  %v759_v31 = vrot.slane %v27_v0, %v2694_v11 }
  0xab   :  { %2376 = vst [vmem:[#allocation2 + $0xb8] sm:$0xff] %v2120_v7  ;;  %2375 = vst [vmem:[#allocation2 + $0xb0] sm:$0xff] %v2119_v8  ;;  %v1866_v13 = vmul.f32 %v230_v9, %v2780_v20  ;;  %v1865_v14 = vmul.f32 %v223_v10, %v2780_v20  ;;  %v731_v9 = vrot.slane %v27_v0, %v2688_v6 }
  0xac   :  { %635 = vbcast.lane.b32.xlu1 %v633_v1, 256  ;;  %628 = vbcast.lane.b32.xlu0 %v626_v2, 256  ;;  %v724_v10 = vrot.slane %v27_v0, %v2684_v4 }
  0xad   :  { %v2122_v19 = vadd.f32 %v1866_v13, %v2787_v23  ;;  %v2121_v21 = vadd.f32 %v1865_v14, %v2787_v23 }
  0xae   :  { %v244_v22 = vpop.permute.xlu1 %243  ;;  %v237_v24 = vpop.permute.xlu0 %236 }
  0xaf   :  { %2378 = vst [vmem:[#allocation2 + $0xc8] sm:$0xff] %v2122_v19  ;;  %2377 = vst [vmem:[#allocation2 + $0xc0] sm:$0xff] %v2121_v21  ;;  %v1868_v25 = vmul.f32 %v244_v22, %v2780_v20  ;;  %v1867_v26 = vmul.f32 %v237_v24, %v2780_v20  ;;  %v745_v22 = vrot.slane %v27_v0, %v2686_v5 }
  0xb0   :  { %649 = vbcast.lane.b32.xlu1 %v647_v17, 256  ;;  %642 = vbcast.lane.b32.xlu0 %v640_v18, 256  ;;  %v738_v24 = vrot.slane %v27_v0, %v2682_v3 }
  0xb1   :  { %v2124_v29 = vadd.f32 %v1868_v25, %v2787_v23  ;;  %v2123_v30 = vadd.f32 %v1867_v26, %v2787_v23 }
  0xb2   :  { %v258_v32 = vpop.permute.xlu1 %257  ;;  %v251_v33 = vpop.permute.xlu0 %250 }
  0xb3   :  { %2380 = vst [vmem:[#allocation2 + $0xd8] sm:$0xff] %v2124_v29  ;;  %2379 = vst [vmem:[#allocation2 + $0xd0] sm:$0xff] %v2123_v30  ;;  %v1870_v34 = vmul.f32 %v258_v32, %v2780_v20  ;;  %v1869_v35 = vmul.f32 %v251_v33, %v2780_v20  ;;  %v752_v32 = vrot.slane %v27_v0, %v2696_v12 }
  0xb4   :  { %663 = vbcast.lane.b32.xlu1 %v661_v27, 256  ;;  %656 = vbcast.lane.b32.xlu0 %v654_v28, 256 }
  0xb5   :  { %v2126_v38 = vadd.f32 %v1870_v34, %v2787_v23  ;;  %v2125_v39 = vadd.f32 %v1869_v35, %v2787_v23 }
  0xb6   :  { %v272_v40 = vpop.permute.xlu1 %271  ;;  %v265_v41 = vpop.permute.xlu0 %264 }
  0xb7   :  { %2382 = vst [vmem:[#allocation2 + $0xe8] sm:$0xff] %v2126_v38  ;;  %2381 = vst [vmem:[#allocation2 + $0xe0] sm:$0xff] %v2125_v39  ;;  %v1872_v42 = vmul.f32 %v272_v40, %v2780_v20  ;;  %v1871_v43 = vmul.f32 %v265_v41, %v2780_v20  ;;  %v773_v39 = vrot.slane %v27_v0, %v2700_v15 }
  0xb8   :  { %677 = vbcast.lane.b32.xlu1 %v675_v36, 256  ;;  %670 = vbcast.lane.b32.xlu0 %v668_v37, 256  ;;  %v766_v40 = vrot.slane %v27_v0, %v2702_v16 }
  0xb9   :  { %v2128_v46 = vadd.f32 %v1872_v42, %v2787_v23  ;;  %v2127_v47 = vadd.f32 %v1871_v43, %v2787_v23  ;;  %v28_v43 = vld [vmem:[%s3601_s0 + $0x68] sm:$0xff] }
  0xba   :  { %v286_v48 = vpop.permute.xlu1 %285  ;;  %v279_v49 = vpop.permute.xlu0 %278  ;;  %v815_v0 = vrot.slane %v28_v43, %v2694_v11 }
  0xbb   :  { %2384 = vst [vmem:[#allocation2 + $0xf8] sm:$0xff] %v2128_v46  ;;  %2383 = vst [vmem:[#allocation2 + $0xf0] sm:$0xff] %v2127_v47  ;;  %v1874_v50 = vmul.f32 %v286_v48, %v2780_v20  ;;  %v1873_v51 = vmul.f32 %v279_v49, %v2780_v20  ;;  %v787_v48 = vrot.slane %v28_v43, %v2688_v6 }
  0xbc   :  { %691 = vbcast.lane.b32.xlu1 %v689_v44, 256  ;;  %684 = vbcast.lane.b32.xlu0 %v682_v45, 256  ;;  %v780_v49 = vrot.slane %v28_v43, %v2684_v4 }
  0xbd   :  { %v2130_v54 = vadd.f32 %v1874_v50, %v2787_v23  ;;  %v2129_v55 = vadd.f32 %v1873_v51, %v2787_v23 }
  0xbe   :  { %v300_v56 = vpop.permute.xlu1 %299  ;;  %v293_v57 = vpop.permute.xlu0 %292 }
  0xbf   :  { %2386 = vst [vmem:[#allocation2 + $0x108] sm:$0xff] %v2130_v54  ;;  %2385 = vst [vmem:[#allocation2 + $0x100] sm:$0xff] %v2129_v55  ;;  %v1876_v58 = vmul.f32 %v300_v56, %v2780_v20  ;;  %v1875_v59 = vmul.f32 %v293_v57, %v2780_v20  ;;  %v801_v56 = vrot.slane %v28_v43, %v2686_v5 }
  0xc0   :  { %705 = vbcast.lane.b32.xlu1 %v703_v52, 256  ;;  %698 = vbcast.lane.b32.xlu0 %v696_v53, 256  ;;  %v794_v57 = vrot.slane %v28_v43, %v2682_v3 }
  0xc1   :  { %v2132_v62 = vadd.f32 %v1876_v58, %v2787_v23  ;;  %v2131_v63 = vadd.f32 %v1875_v59, %v2787_v23 }
  0xc2   :  { %v314_v1 = vpop.permute.xlu1 %313  ;;  %v307_v2 = vpop.permute.xlu0 %306 }
  0xc3   :  { %2388 = vst [vmem:[#allocation2 + $0x118] sm:$0xff] %v2132_v62  ;;  %2387 = vst [vmem:[#allocation2 + $0x110] sm:$0xff] %v2131_v63  ;;  %v1878_v7 = vmul.f32 %v314_v1, %v2780_v20  ;;  %v1877_v8 = vmul.f32 %v307_v2, %v2780_v20  ;;  %v808_v1 = vrot.slane %v28_v43, %v2696_v12 }
  0xc4   :  { %719 = vbcast.lane.b32.xlu1 %v717_v60, 256  ;;  %712 = vbcast.lane.b32.xlu0 %v710_v61, 256 }
  0xc5   :  { %v2134_v13 = vadd.f32 %v1878_v7, %v2787_v23  ;;  %v2133_v14 = vadd.f32 %v1877_v8, %v2787_v23 }
  0xc6   :  { %v328_v17 = vpop.permute.xlu1 %327  ;;  %v321_v18 = vpop.permute.xlu0 %320 }
  0xc7   :  { %2390 = vst [vmem:[#allocation2 + $0x128] sm:$0xff] %v2134_v13  ;;  %2389 = vst [vmem:[#allocation2 + $0x120] sm:$0xff] %v2133_v14  ;;  %v1880_v19 = vmul.f32 %v328_v17, %v2780_v20  ;;  %v1879_v21 = vmul.f32 %v321_v18, %v2780_v20  ;;  %v829_v14 = vrot.slane %v28_v43, %v2700_v15 }
  0xc8   :  { %733 = vbcast.lane.b32.xlu1 %v731_v9, 256  ;;  %726 = vbcast.lane.b32.xlu0 %v724_v10, 256  ;;  %v822_v17 = vrot.slane %v28_v43, %v2702_v16 }
  0xc9   :  { %v2136_v25 = vadd.f32 %v1880_v19, %v2787_v23  ;;  %v2135_v26 = vadd.f32 %v1879_v21, %v2787_v23  ;;  %v29_v21 = vld [vmem:[%s3601_s0 + $0x70] sm:$0xff] }
  0xca   :  { %v342_v27 = vpop.permute.xlu1 %341  ;;  %v335_v28 = vpop.permute.xlu0 %334  ;;  %v871_v43 = vrot.slane %v29_v21, %v2694_v11 }
  0xcb   :  { %2392 = vst [vmem:[#allocation2 + $0x138] sm:$0xff] %v2136_v25  ;;  %2391 = vst [vmem:[#allocation2 + $0x130] sm:$0xff] %v2135_v26  ;;  %v1882_v29 = vmul.f32 %v342_v27, %v2780_v20  ;;  %v1881_v30 = vmul.f32 %v335_v28, %v2780_v20  ;;  %v843_v27 = vrot.slane %v29_v21, %v2688_v6 }
  0xcc   :  { %747 = vbcast.lane.b32.xlu1 %v745_v22, 256  ;;  %740 = vbcast.lane.b32.xlu0 %v738_v24, 256  ;;  %v836_v28 = vrot.slane %v29_v21, %v2684_v4 }
  0xcd   :  { %v2138_v33 = vadd.f32 %v1882_v29, %v2787_v23  ;;  %v2137_v34 = vadd.f32 %v1881_v30, %v2787_v23 }
  0xce   :  { %v356_v35 = vpop.permute.xlu1 %355  ;;  %v349_v36 = vpop.permute.xlu0 %348 }
  0xcf   :  { %2394 = vst [vmem:[#allocation2 + $0x148] sm:$0xff] %v2138_v33  ;;  %2393 = vst [vmem:[#allocation2 + $0x140] sm:$0xff] %v2137_v34  ;;  %v1884_v37 = vmul.f32 %v356_v35, %v2780_v20  ;;  %v1883_v38 = vmul.f32 %v349_v36, %v2780_v20  ;;  %v857_v35 = vrot.slane %v29_v21, %v2686_v5 }
  0xd0   :  { %761 = vbcast.lane.b32.xlu1 %v759_v31, 256  ;;  %754 = vbcast.lane.b32.xlu0 %v752_v32, 256  ;;  %v850_v36 = vrot.slane %v29_v21, %v2682_v3 }
  0xd1   :  { %v2140_v41 = vadd.f32 %v1884_v37, %v2787_v23  ;;  %v2139_v42 = vadd.f32 %v1883_v38, %v2787_v23 }
  0xd2   :  { %v370_v44 = vpop.permute.xlu1 %369  ;;  %v363_v45 = vpop.permute.xlu0 %362 }
  0xd3   :  { %2396 = vst [vmem:[#allocation2 + $0x158] sm:$0xff] %v2140_v41  ;;  %2395 = vst [vmem:[#allocation2 + $0x150] sm:$0xff] %v2139_v42  ;;  %v1886_v46 = vmul.f32 %v370_v44, %v2780_v20  ;;  %v1885_v47 = vmul.f32 %v363_v45, %v2780_v20  ;;  %v864_v44 = vrot.slane %v29_v21, %v2696_v12 }
  0xd4   :  { %775 = vbcast.lane.b32.xlu1 %v773_v39, 256  ;;  %768 = vbcast.lane.b32.xlu0 %v766_v40, 256 }
  0xd5   :  { %v2142_v50 = vadd.f32 %v1886_v46, %v2787_v23  ;;  %v2141_v51 = vadd.f32 %v1885_v47, %v2787_v23 }
  0xd6   :  { %v384_v52 = vpop.permute.xlu1 %383  ;;  %v377_v53 = vpop.permute.xlu0 %376 }
  0xd7   :  { %2398 = vst [vmem:[#allocation2 + $0x168] sm:$0xff] %v2142_v50  ;;  %2397 = vst [vmem:[#allocation2 + $0x160] sm:$0xff] %v2141_v51  ;;  %v1888_v54 = vmul.f32 %v384_v52, %v2780_v20  ;;  %v1887_v55 = vmul.f32 %v377_v53, %v2780_v20  ;;  %v885_v51 = vrot.slane %v29_v21, %v2700_v15 }
  0xd8   :  { %789 = vbcast.lane.b32.xlu1 %v787_v48, 256  ;;  %782 = vbcast.lane.b32.xlu0 %v780_v49, 256  ;;  %v878_v52 = vrot.slane %v29_v21, %v2702_v16 }
  0xd9   :  { %v2144_v58 = vadd.f32 %v1888_v54, %v2787_v23  ;;  %v2143_v59 = vadd.f32 %v1887_v55, %v2787_v23  ;;  %v30_v55 = vld [vmem:[%s3601_s0 + $0x78] sm:$0xff] }
  0xda   :  { %v398_v60 = vpop.permute.xlu1 %397  ;;  %v391_v61 = vpop.permute.xlu0 %390  ;;  %v927_v21 = vrot.slane %v30_v55, %v2694_v11 }
  0xdb   :  { %2400 = vst [vmem:[#allocation2 + $0x178] sm:$0xff] %v2144_v58  ;;  %2399 = vst [vmem:[#allocation2 + $0x170] sm:$0xff] %v2143_v59  ;;  %v1890_v62 = vmul.f32 %v398_v60, %v2780_v20  ;;  %v1889_v63 = vmul.f32 %v391_v61, %v2780_v20  ;;  %v899_v60 = vrot.slane %v30_v55, %v2688_v6 }
  0xdc   :  { %803 = vbcast.lane.b32.xlu1 %v801_v56, 256  ;;  %796 = vbcast.lane.b32.xlu0 %v794_v57, 256  ;;  %v892_v61 = vrot.slane %v30_v55, %v2684_v4 }
  0xdd   :  { %v2146_v2 = vadd.f32 %v1890_v62, %v2787_v23  ;;  %v2145_v7 = vadd.f32 %v1889_v63, %v2787_v23 }
  0xde   :  { %v412_v8 = vpop.permute.xlu1 %411  ;;  %v405_v9 = vpop.permute.xlu0 %404 }
  0xdf   :  { %2402 = vst [vmem:[#allocation2 + $0x188] sm:$0xff] %v2146_v2  ;;  %2401 = vst [vmem:[#allocation2 + $0x180] sm:$0xff] %v2145_v7  ;;  %v1892_v10 = vmul.f32 %v412_v8, %v2780_v20  ;;  %v1891_v13 = vmul.f32 %v405_v9, %v2780_v20  ;;  %v913_v8 = vrot.slane %v30_v55, %v2686_v5 }
  0xe0   :  { %817 = vbcast.lane.b32.xlu1 %v815_v0, 256  ;;  %810 = vbcast.lane.b32.xlu0 %v808_v1, 256  ;;  %v906_v9 = vrot.slane %v30_v55, %v2682_v3 }
  0xe1   :  { %v2148_v18 = vadd.f32 %v1892_v10, %v2787_v23  ;;  %v2147_v19 = vadd.f32 %v1891_v13, %v2787_v23 }
  0xe2   :  { %v426_v22 = vpop.permute.xlu1 %425  ;;  %v419_v24 = vpop.permute.xlu0 %418 }
  0xe3   :  { %2404 = vst [vmem:[#allocation2 + $0x198] sm:$0xff] %v2148_v18  ;;  %2403 = vst [vmem:[#allocation2 + $0x190] sm:$0xff] %v2147_v19  ;;  %v1894_v25 = vmul.f32 %v426_v22, %v2780_v20  ;;  %v1893_v26 = vmul.f32 %v419_v24, %v2780_v20  ;;  %v920_v22 = vrot.slane %v30_v55, %v2696_v12 }
  0xe4   :  { %831 = vbcast.lane.b32.xlu1 %v829_v14, 256  ;;  %824 = vbcast.lane.b32.xlu0 %v822_v17, 256 }
  0xe5   :  { %v2150_v29 = vadd.f32 %v1894_v25, %v2787_v23  ;;  %v2149_v30 = vadd.f32 %v1893_v26, %v2787_v23 }
  0xe6   :  { %v440_v31 = vpop.permute.xlu1 %439  ;;  %v433_v32 = vpop.permute.xlu0 %432 }
  0xe7   :  { %2406 = vst [vmem:[#allocation2 + $0x1a8] sm:$0xff] %v2150_v29  ;;  %2405 = vst [vmem:[#allocation2 + $0x1a0] sm:$0xff] %v2149_v30  ;;  %v1896_v33 = vmul.f32 %v440_v31, %v2780_v20  ;;  %v1895_v34 = vmul.f32 %v433_v32, %v2780_v20  ;;  %v941_v30 = vrot.slane %v30_v55, %v2700_v15 }
  0xe8   :  { %845 = vbcast.lane.b32.xlu1 %v843_v27, 256  ;;  %838 = vbcast.lane.b32.xlu0 %v836_v28, 256  ;;  %v934_v31 = vrot.slane %v30_v55, %v2702_v16 }
  0xe9   :  { %v2152_v37 = vadd.f32 %v1896_v33, %v2787_v23  ;;  %v2151_v38 = vadd.f32 %v1895_v34, %v2787_v23  ;;  %v31_v34 = vld [vmem:[%s3601_s0 + $0x80] sm:$0xff] }
  0xea   :  { %v454_v39 = vpop.permute.xlu1 %453  ;;  %v447_v40 = vpop.permute.xlu0 %446  ;;  %v983_v55 = vrot.slane %v31_v34, %v2694_v11 }
  0xeb   :  { %2408 = vst [vmem:[#allocation2 + $0x1b8] sm:$0xff] %v2152_v37  ;;  %2407 = vst [vmem:[#allocation2 + $0x1b0] sm:$0xff] %v2151_v38  ;;  %v1898_v41 = vmul.f32 %v454_v39, %v2780_v20  ;;  %v1897_v42 = vmul.f32 %v447_v40, %v2780_v20  ;;  %v955_v39 = vrot.slane %v31_v34, %v2688_v6 }
  0xec   :  { %859 = vbcast.lane.b32.xlu1 %v857_v35, 256  ;;  %852 = vbcast.lane.b32.xlu0 %v850_v36, 256  ;;  %v948_v40 = vrot.slane %v31_v34, %v2684_v4 }
  0xed   :  { %v2154_v45 = vadd.f32 %v1898_v41, %v2787_v23  ;;  %v2153_v46 = vadd.f32 %v1897_v42, %v2787_v23 }
  0xee   :  { %v468_v47 = vpop.permute.xlu1 %467  ;;  %v461_v48 = vpop.permute.xlu0 %460 }
  0xef   :  { %2410 = vst [vmem:[#allocation2 + $0x1c8] sm:$0xff] %v2154_v45  ;;  %2409 = vst [vmem:[#allocation2 + $0x1c0] sm:$0xff] %v2153_v46  ;;  %v1900_v49 = vmul.f32 %v468_v47, %v2780_v20  ;;  %v1899_v50 = vmul.f32 %v461_v48, %v2780_v20  ;;  %v969_v47 = vrot.slane %v31_v34, %v2686_v5 }
  0xf0   :  { %873 = vbcast.lane.b32.xlu1 %v871_v43, 256  ;;  %866 = vbcast.lane.b32.xlu0 %v864_v44, 256  ;;  %v962_v48 = vrot.slane %v31_v34, %v2682_v3 }
  0xf1   :  { %v2156_v53 = vadd.f32 %v1900_v49, %v2787_v23  ;;  %v2155_v54 = vadd.f32 %v1899_v50, %v2787_v23 }
  0xf2   :  { %v482_v56 = vpop.permute.xlu1 %481  ;;  %v475_v57 = vpop.permute.xlu0 %474 }
  0xf3   :  { %2412 = vst [vmem:[#allocation2 + $0x1d8] sm:$0xff] %v2156_v53  ;;  %2411 = vst [vmem:[#allocation2 + $0x1d0] sm:$0xff] %v2155_v54  ;;  %v1902_v58 = vmul.f32 %v482_v56, %v2780_v20  ;;  %v1901_v59 = vmul.f32 %v475_v57, %v2780_v20  ;;  %v976_v56 = vrot.slane %v31_v34, %v2696_v12 }
  0xf4   :  { %887 = vbcast.lane.b32.xlu1 %v885_v51, 256  ;;  %880 = vbcast.lane.b32.xlu0 %v878_v52, 256 }
  0xf5   :  { %v2158_v62 = vadd.f32 %v1902_v58, %v2787_v23  ;;  %v2157_v63 = vadd.f32 %v1901_v59, %v2787_v23 }
  0xf6   :  { %v496_v0 = vpop.permute.xlu1 %495  ;;  %v489_v1 = vpop.permute.xlu0 %488 }
  0xf7   :  { %2414 = vst [vmem:[#allocation2 + $0x1e8] sm:$0xff] %v2158_v62  ;;  %2413 = vst [vmem:[#allocation2 + $0x1e0] sm:$0xff] %v2157_v63  ;;  %v1904_v2 = vmul.f32 %v496_v0, %v2780_v20  ;;  %v1903_v7 = vmul.f32 %v489_v1, %v2780_v20  ;;  %v997_v63 = vrot.slane %v31_v34, %v2700_v15 }
  0xf8   :  { %901 = vbcast.lane.b32.xlu1 %v899_v60, 256  ;;  %894 = vbcast.lane.b32.xlu0 %v892_v61, 256  ;;  %v990_v0 = vrot.slane %v31_v34, %v2702_v16 }
  0xf9   :  { %v2160_v10 = vadd.f32 %v1904_v2, %v2787_v23  ;;  %v2159_v13 = vadd.f32 %v1903_v7, %v2787_v23  ;;  %v32_v7 = vld [vmem:[%s3601_s0 + $0x88] sm:$0xff] }
  0xfa   :  { %v510_v14 = vpop.permute.xlu1 %509  ;;  %v503_v17 = vpop.permute.xlu0 %502  ;;  %v1039_v34 = vrot.slane %v32_v7, %v2694_v11 }
  0xfb   :  { %2416 = vst [vmem:[#allocation2 + $0x1f8] sm:$0xff] %v2160_v10  ;;  %2415 = vst [vmem:[#allocation2 + $0x1f0] sm:$0xff] %v2159_v13  ;;  %v1906_v18 = vmul.f32 %v510_v14, %v2780_v20  ;;  %v1905_v19 = vmul.f32 %v503_v17, %v2780_v20  ;;  %v1011_v14 = vrot.slane %v32_v7, %v2688_v6 }
  0xfc   :  { %915 = vbcast.lane.b32.xlu1 %v913_v8, 256  ;;  %908 = vbcast.lane.b32.xlu0 %v906_v9, 256  ;;  %v1004_v17 = vrot.slane %v32_v7, %v2684_v4 }
  0xfd   :  { %v2162_v24 = vadd.f32 %v1906_v18, %v2787_v23  ;;  %v2161_v25 = vadd.f32 %v1905_v19, %v2787_v23 }
  0xfe   :  { %v524_v26 = vpop.permute.xlu1 %523  ;;  %v517_v27 = vpop.permute.xlu0 %516 }
  0xff   :  { %2418 = vst [vmem:[#allocation2 + $0x208] sm:$0xff] %v2162_v24  ;;  %2417 = vst [vmem:[#allocation2 + $0x200] sm:$0xff] %v2161_v25  ;;  %v1908_v28 = vmul.f32 %v524_v26, %v2780_v20  ;;  %v1907_v29 = vmul.f32 %v517_v27, %v2780_v20  ;;  %v1025_v26 = vrot.slane %v32_v7, %v2686_v5 }
 0x100   :  { %929 = vbcast.lane.b32.xlu1 %v927_v21, 256  ;;  %922 = vbcast.lane.b32.xlu0 %v920_v22, 256  ;;  %v1018_v27 = vrot.slane %v32_v7, %v2682_v3 }
 0x101   :  { %v2164_v32 = vadd.f32 %v1908_v28, %v2787_v23  ;;  %v2163_v33 = vadd.f32 %v1907_v29, %v2787_v23 }
 0x102   :  { %v538_v35 = vpop.permute.xlu1 %537  ;;  %v531_v36 = vpop.permute.xlu0 %530 }
 0x103   :  { %2420 = vst [vmem:[#allocation2 + $0x218] sm:$0xff] %v2164_v32  ;;  %2419 = vst [vmem:[#allocation2 + $0x210] sm:$0xff] %v2163_v33  ;;  %v1910_v37 = vmul.f32 %v538_v35, %v2780_v20  ;;  %v1909_v38 = vmul.f32 %v531_v36, %v2780_v20  ;;  %v1032_v35 = vrot.slane %v32_v7, %v2696_v12 }
 0x104   :  { %943 = vbcast.lane.b32.xlu1 %v941_v30, 256  ;;  %936 = vbcast.lane.b32.xlu0 %v934_v31, 256 }
 0x105   :  { %v2166_v41 = vadd.f32 %v1910_v37, %v2787_v23  ;;  %v2165_v42 = vadd.f32 %v1909_v38, %v2787_v23 }
 0x106   :  { %v552_v43 = vpop.permute.xlu1 %551  ;;  %v545_v44 = vpop.permute.xlu0 %544 }
 0x107   :  { %2422 = vst [vmem:[#allocation2 + $0x228] sm:$0xff] %v2166_v41  ;;  %2421 = vst [vmem:[#allocation2 + $0x220] sm:$0xff] %v2165_v42  ;;  %v1912_v45 = vmul.f32 %v552_v43, %v2780_v20  ;;  %v1911_v46 = vmul.f32 %v545_v44, %v2780_v20  ;;  %v1053_v42 = vrot.slane %v32_v7, %v2700_v15 }
 0x108   :  { %957 = vbcast.lane.b32.xlu1 %v955_v39, 256  ;;  %950 = vbcast.lane.b32.xlu0 %v948_v40, 256  ;;  %v1046_v43 = vrot.slane %v32_v7, %v2702_v16 }
 0x109   :  { %v2168_v49 = vadd.f32 %v1912_v45, %v2787_v23  ;;  %v2167_v50 = vadd.f32 %v1911_v46, %v2787_v23  ;;  %v3073_v45 = vld [vmem:[%s3603_s2] sm:$0xff] }
 0x10a   :  { %v566_v51 = vpop.permute.xlu1 %565  ;;  %v559_v52 = vpop.permute.xlu0 %558 }
 0x10b   :  { %2424 = vst [vmem:[#allocation2 + $0x238] sm:$0xff] %v2168_v49  ;;  %2423 = vst [vmem:[#allocation2 + $0x230] sm:$0xff] %v2167_v50  ;;  %v1914_v53 = vmul.f32 %v566_v51, %v2780_v20  ;;  %v1913_v54 = vmul.f32 %v559_v52, %v2780_v20  ;;  %v3082_v49 = vld [vmem:[%s3602_s1] sm:$0xff] }
 0x10c   :  { %971 = vbcast.lane.b32.xlu1 %v969_v47, 256  ;;  %964 = vbcast.lane.b32.xlu0 %v962_v48, 256  ;;  %v33_v47 = vld [vmem:[%s3601_s0 + $0x90] sm:$0xff] }
 0x10d   :  { %v2170_v57 = vadd.f32 %v1914_v53, %v2787_v23  ;;  %v2169_v58 = vadd.f32 %v1913_v54, %v2787_v23  ;;  %v1067_v51 = vrot.slane %v33_v47, %v2688_v6  ;;  %v1060_v52 = vrot.slane %v33_v47, %v2684_v4 }
 0x10e   :  { %v580_v59 = vpop.permute.xlu1 %579  ;;  %v573_v60 = vpop.permute.xlu0 %572  ;;  %v1095_v7 = vrot.slane %v33_v47, %v2694_v11 }
 0x10f   :  { %2426 = vst [vmem:[#allocation2 + $0x248] sm:$0xff] %v2170_v57  ;;  %2425 = vst [vmem:[#allocation2 + $0x240] sm:$0xff] %v2169_v58  ;;  %v1916_v61 = vmul.f32 %v580_v59, %v2780_v20  ;;  %v1915_v62 = vmul.f32 %v573_v60, %v2780_v20  ;;  %v1081_v59 = vrot.slane %v33_v47, %v2686_v5 }
 0x110   :  { %985 = vbcast.lane.b32.xlu1 %v983_v55, 256  ;;  %978 = vbcast.lane.b32.xlu0 %v976_v56, 256  ;;  %v1074_v60 = vrot.slane %v33_v47, %v2682_v3 }
 0x111   :  { %v2172_v1 = vadd.f32 %v1916_v61, %v2787_v23  ;;  %v2171_v2 = vadd.f32 %v1915_v62, %v2787_v23 }
 0x112   :  { %v594_v8 = vpop.permute.xlu1 %593  ;;  %v587_v9 = vpop.permute.xlu0 %586 }
 0x113   :  { %2428 = vst [vmem:[#allocation2 + $0x258] sm:$0xff] %v2172_v1  ;;  %2427 = vst [vmem:[#allocation2 + $0x250] sm:$0xff] %v2171_v2  ;;  %v1918_v10 = vmul.f32 %v594_v8, %v2780_v20  ;;  %v1917_v13 = vmul.f32 %v587_v9, %v2780_v20  ;;  %v1088_v8 = vrot.slane %v33_v47, %v2696_v12 }
 0x114   :  { %999 = vbcast.lane.b32.xlu1 %v997_v63, 256  ;;  %992 = vbcast.lane.b32.xlu0 %v990_v0, 256 }
 0x115   :  { %v2174_v18 = vadd.f32 %v1918_v10, %v2787_v23  ;;  %v2173_v19 = vadd.f32 %v1917_v13, %v2787_v23 }
 0x116   :  { %v608_v21 = vpop.permute.xlu1 %607  ;;  %v601_v22 = vpop.permute.xlu0 %600 }
 0x117   :  { %2430 = vst [vmem:[#allocation2 + $0x268] sm:$0xff] %v2174_v18  ;;  %2429 = vst [vmem:[#allocation2 + $0x260] sm:$0xff] %v2173_v19  ;;  %v1920_v24 = vmul.f32 %v608_v21, %v2780_v20  ;;  %v1919_v25 = vmul.f32 %v601_v22, %v2780_v20  ;;  %v1109_v19 = vrot.slane %v33_v47, %v2700_v15 }
 0x118   :  { %1013 = vbcast.lane.b32.xlu1 %v1011_v14, 256  ;;  %1006 = vbcast.lane.b32.xlu0 %v1004_v17, 256  ;;  %v1102_v21 = vrot.slane %v33_v47, %v2702_v16 }
 0x119   :  { %v2176_v28 = vadd.f32 %v1920_v24, %v2787_v23  ;;  %v2175_v29 = vadd.f32 %v1919_v25, %v2787_v23  ;;  %v34_v25 = vld [vmem:[%s3601_s0 + $0x98] sm:$0xff] }
 0x11a   :  { %v622_v30 = vpop.permute.xlu1 %621  ;;  %v615_v31 = vpop.permute.xlu0 %614  ;;  %v1151_v47 = vrot.slane %v34_v25, %v2694_v11 }
 0x11b   :  { %2432 = vst [vmem:[#allocation2 + $0x278] sm:$0xff] %v2176_v28  ;;  %2431 = vst [vmem:[#allocation2 + $0x270] sm:$0xff] %v2175_v29  ;;  %v1922_v32 = vmul.f32 %v622_v30, %v2780_v20  ;;  %v1921_v33 = vmul.f32 %v615_v31, %v2780_v20  ;;  %v1123_v30 = vrot.slane %v34_v25, %v2688_v6 }
 0x11c   :  { %1027 = vbcast.lane.b32.xlu1 %v1025_v26, 256  ;;  %1020 = vbcast.lane.b32.xlu0 %v1018_v27, 256  ;;  %v1116_v31 = vrot.slane %v34_v25, %v2684_v4 }
 0x11d   :  { %v2178_v36 = vadd.f32 %v1922_v32, %v2787_v23  ;;  %v2177_v37 = vadd.f32 %v1921_v33, %v2787_v23 }
 0x11e   :  { %v636_v38 = vpop.permute.xlu1 %635  ;;  %v629_v39 = vpop.permute.xlu0 %628 }
 0x11f   :  { %2434 = vst [vmem:[#allocation2 + $0x288] sm:$0xff] %v2178_v36  ;;  %2433 = vst [vmem:[#allocation2 + $0x280] sm:$0xff] %v2177_v37  ;;  %v1924_v40 = vmul.f32 %v636_v38, %v2780_v20  ;;  %v1923_v41 = vmul.f32 %v629_v39, %v2780_v20  ;;  %v1137_v38 = vrot.slane %v34_v25, %v2686_v5 }
 0x120   :  { %1041 = vbcast.lane.b32.xlu1 %v1039_v34, 256  ;;  %1034 = vbcast.lane.b32.xlu0 %v1032_v35, 256  ;;  %v1130_v39 = vrot.slane %v34_v25, %v2682_v3 }
 0x121   :  { %v2180_v44 = vadd.f32 %v1924_v40, %v2787_v23  ;;  %v2179_v46 = vadd.f32 %v3073_v45, %v1923_v41 }
 0x122   :  { %v650_v20 = vpop.permute.xlu1 %649  ;;  %v643_v48 = vpop.permute.xlu0 %642 }
 0x123   :  { %2436 = vst [vmem:[#allocation2 + $0x298] sm:$0xff] %v2180_v44  ;;  %2435 = vst [vmem:[#allocation2 + $0x290] sm:$0xff] %v2179_v46  ;;  %v1926_v23 = vmul.f32 %v3082_v49, %v650_v20  ;;  %v1925_v50 = vmul.f32 %v3082_v49, %v643_v48  ;;  %v1144_v20 = vrot.slane %v34_v25, %v2696_v12 }
 0x124   :  { %1055 = vbcast.lane.b32.xlu1 %v1053_v42, 256  ;;  %1048 = vbcast.lane.b32.xlu0 %v1046_v43, 256 }
 0x125   :  { %v2182_v53 = vadd.f32 %v3073_v45, %v1926_v23  ;;  %v2181_v54 = vadd.f32 %v3073_v45, %v1925_v50 }
 0x126   :  { %v664_v55 = vpop.permute.xlu1 %663  ;;  %v657_v56 = vpop.permute.xlu0 %656 }
 0x127   :  { %2438 = vst [vmem:[#allocation2 + $0x2a8] sm:$0xff] %v2182_v53  ;;  %2437 = vst [vmem:[#allocation2 + $0x2a0] sm:$0xff] %v2181_v54  ;;  %v1928_v57 = vmul.f32 %v3082_v49, %v664_v55  ;;  %v1927_v58 = vmul.f32 %v3082_v49, %v657_v56  ;;  %v1165_v54 = vrot.slane %v34_v25, %v2700_v15 }
 0x128   :  { %1069 = vbcast.lane.b32.xlu1 %v1067_v51, 256  ;;  %1062 = vbcast.lane.b32.xlu0 %v1060_v52, 256  ;;  %v1158_v55 = vrot.slane %v34_v25, %v2702_v16 }
 0x129   :  { %v2184_v61 = vadd.f32 %v3073_v45, %v1928_v57  ;;  %v2183_v62 = vadd.f32 %v3073_v45, %v1927_v58  ;;  %v35_v58 = vld [vmem:[%s3601_s0 + $0xa0] sm:$0xff] }
 0x12a   :  { %v678_v63 = vpop.permute.xlu1 %677  ;;  %v671_v0 = vpop.permute.xlu0 %670  ;;  %v1207_v25 = vrot.slane %v35_v58, %v2694_v11 }
 0x12b   :  { %2440 = vst [vmem:[#allocation2 + $0x2b8] sm:$0xff] %v2184_v61  ;;  %2439 = vst [vmem:[#allocation2 + $0x2b0] sm:$0xff] %v2183_v62  ;;  %v1930_v1 = vmul.f32 %v3082_v49, %v678_v63  ;;  %v1929_v2 = vmul.f32 %v3082_v49, %v671_v0  ;;  %v1179_v63 = vrot.slane %v35_v58, %v2688_v6 }
 0x12c   :  { %1083 = vbcast.lane.b32.xlu1 %v1081_v59, 256  ;;  %1076 = vbcast.lane.b32.xlu0 %v1074_v60, 256  ;;  %v1172_v0 = vrot.slane %v35_v58, %v2684_v4 }
 0x12d   :  { %v2186_v9 = vadd.f32 %v3073_v45, %v1930_v1  ;;  %v2185_v10 = vadd.f32 %v3073_v45, %v1929_v2 }
 0x12e   :  { %v692_v13 = vpop.permute.xlu1 %691  ;;  %v685_v14 = vpop.permute.xlu0 %684 }
 0x12f   :  { %2442 = vst [vmem:[#allocation2 + $0x2c8] sm:$0xff] %v2186_v9  ;;  %2441 = vst [vmem:[#allocation2 + $0x2c0] sm:$0xff] %v2185_v10  ;;  %v1932_v17 = vmul.f32 %v3082_v49, %v692_v13  ;;  %v1931_v18 = vmul.f32 %v3082_v49, %v685_v14  ;;  %v1193_v13 = vrot.slane %v35_v58, %v2686_v5 }
 0x130   :  { %1097 = vbcast.lane.b32.xlu1 %v1095_v7, 256  ;;  %1090 = vbcast.lane.b32.xlu0 %v1088_v8, 256  ;;  %v1186_v14 = vrot.slane %v35_v58, %v2682_v3 }
 0x131   :  { %v2188_v22 = vadd.f32 %v3073_v45, %v1932_v17  ;;  %v2187_v24 = vadd.f32 %v3073_v45, %v1931_v18 }
 0x132   :  { %v706_v26 = vpop.permute.xlu1 %705  ;;  %v699_v27 = vpop.permute.xlu0 %698 }
 0x133   :  { %2444 = vst [vmem:[#allocation2 + $0x2d8] sm:$0xff] %v2188_v22  ;;  %2443 = vst [vmem:[#allocation2 + $0x2d0] sm:$0xff] %v2187_v24  ;;  %v1934_v28 = vmul.f32 %v3082_v49, %v706_v26  ;;  %v1933_v29 = vmul.f32 %v3082_v49, %v699_v27  ;;  %v1200_v26 = vrot.slane %v35_v58, %v2696_v12 }
 0x134   :  { %1111 = vbcast.lane.b32.xlu1 %v1109_v19, 256  ;;  %1104 = vbcast.lane.b32.xlu0 %v1102_v21, 256 }
 0x135   :  { %v2190_v32 = vadd.f32 %v3073_v45, %v1934_v28  ;;  %v2189_v33 = vadd.f32 %v3073_v45, %v1933_v29 }
 0x136   :  { %v720_v34 = vpop.permute.xlu1 %719  ;;  %v713_v35 = vpop.permute.xlu0 %712 }
 0x137   :  { %2446 = vst [vmem:[#allocation2 + $0x2e8] sm:$0xff] %v2190_v32  ;;  %2445 = vst [vmem:[#allocation2 + $0x2e0] sm:$0xff] %v2189_v33  ;;  %v1936_v36 = vmul.f32 %v3082_v49, %v720_v34  ;;  %v1935_v37 = vmul.f32 %v3082_v49, %v713_v35  ;;  %v1221_v33 = vrot.slane %v35_v58, %v2700_v15 }
 0x138   :  { %1125 = vbcast.lane.b32.xlu1 %v1123_v30, 256  ;;  %1118 = vbcast.lane.b32.xlu0 %v1116_v31, 256  ;;  %v1214_v34 = vrot.slane %v35_v58, %v2702_v16 }
 0x139   :  { %v2192_v40 = vadd.f32 %v3073_v45, %v1936_v36  ;;  %v2191_v41 = vadd.f32 %v3073_v45, %v1935_v37  ;;  %v36_v37 = vld [vmem:[%s3601_s0 + $0xa8] sm:$0xff] }
 0x13a   :  { %v734_v42 = vpop.permute.xlu1 %733  ;;  %v727_v43 = vpop.permute.xlu0 %726  ;;  %v1263_v58 = vrot.slane %v36_v37, %v2694_v11 }
 0x13b   :  { %2448 = vst [vmem:[#allocation2 + $0x2f8] sm:$0xff] %v2192_v40  ;;  %2447 = vst [vmem:[#allocation2 + $0x2f0] sm:$0xff] %v2191_v41  ;;  %v1938_v44 = vmul.f32 %v3082_v49, %v734_v42  ;;  %v1937_v46 = vmul.f32 %v3082_v49, %v727_v43  ;;  %v1235_v42 = vrot.slane %v36_v37, %v2688_v6 }
 0x13c   :  { %1139 = vbcast.lane.b32.xlu1 %v1137_v38, 256  ;;  %1132 = vbcast.lane.b32.xlu0 %v1130_v39, 256  ;;  %v1228_v43 = vrot.slane %v36_v37, %v2684_v4 }
 0x13d   :  { %v2194_v48 = vadd.f32 %v3073_v45, %v1938_v44  ;;  %v2193_v23 = vadd.f32 %v3073_v45, %v1937_v46 }
 0x13e   :  { %v748_v50 = vpop.permute.xlu1 %747  ;;  %v741_v51 = vpop.permute.xlu0 %740 }
 0x13f   :  { %2450 = vst [vmem:[#allocation2 + $0x308] sm:$0xff] %v2194_v48  ;;  %2449 = vst [vmem:[#allocation2 + $0x300] sm:$0xff] %v2193_v23  ;;  %v1940_v52 = vmul.f32 %v3082_v49, %v748_v50  ;;  %v1939_v53 = vmul.f32 %v3082_v49, %v741_v51  ;;  %v1249_v50 = vrot.slane %v36_v37, %v2686_v5 }
 0x140   :  { %1153 = vbcast.lane.b32.xlu1 %v1151_v47, 256  ;;  %1146 = vbcast.lane.b32.xlu0 %v1144_v20, 256  ;;  %v1242_v51 = vrot.slane %v36_v37, %v2682_v3 }
 0x141   :  { %v2196_v56 = vadd.f32 %v3073_v45, %v1940_v52  ;;  %v2195_v57 = vadd.f32 %v3073_v45, %v1939_v53 }
 0x142   :  { %v762_v59 = vpop.permute.xlu1 %761  ;;  %v755_v60 = vpop.permute.xlu0 %754 }
 0x143   :  { %2452 = vst [vmem:[#allocation2 + $0x318] sm:$0xff] %v2196_v56  ;;  %2451 = vst [vmem:[#allocation2 + $0x310] sm:$0xff] %v2195_v57  ;;  %v1942_v61 = vmul.f32 %v3082_v49, %v762_v59  ;;  %v1941_v62 = vmul.f32 %v3082_v49, %v755_v60  ;;  %v1256_v59 = vrot.slane %v36_v37, %v2696_v12 }
 0x144   :  { %1167 = vbcast.lane.b32.xlu1 %v1165_v54, 256  ;;  %1160 = vbcast.lane.b32.xlu0 %v1158_v55, 256 }
 0x145   :  { %v2198_v1 = vadd.f32 %v3073_v45, %v1942_v61  ;;  %v2197_v2 = vadd.f32 %v3073_v45, %v1941_v62 }
 0x146   :  { %v776_v7 = vpop.permute.xlu1 %775  ;;  %v769_v8 = vpop.permute.xlu0 %768 }
 0x147   :  { %2454 = vst [vmem:[#allocation2 + $0x328] sm:$0xff] %v2198_v1  ;;  %2453 = vst [vmem:[#allocation2 + $0x320] sm:$0xff] %v2197_v2  ;;  %v1944_v9 = vmul.f32 %v3082_v49, %v776_v7  ;;  %v1943_v10 = vmul.f32 %v3082_v49, %v769_v8  ;;  %v1277_v2 = vrot.slane %v36_v37, %v2700_v15 }
 0x148   :  { %1181 = vbcast.lane.b32.xlu1 %v1179_v63, 256  ;;  %1174 = vbcast.lane.b32.xlu0 %v1172_v0, 256  ;;  %v1270_v7 = vrot.slane %v36_v37, %v2702_v16 }
 0x149   :  { %v2200_v17 = vadd.f32 %v3073_v45, %v1944_v9  ;;  %v2199_v18 = vadd.f32 %v3073_v45, %v1943_v10  ;;  %v37_v10 = vld [vmem:[%s3601_s0 + $0xb0] sm:$0xff] }
 0x14a   :  { %v790_v19 = vpop.permute.xlu1 %789  ;;  %v783_v21 = vpop.permute.xlu0 %782  ;;  %v1319_v37 = vrot.slane %v37_v10, %v2694_v11 }
 0x14b   :  { %2456 = vst [vmem:[#allocation2 + $0x338] sm:$0xff] %v2200_v17  ;;  %2455 = vst [vmem:[#allocation2 + $0x330] sm:$0xff] %v2199_v18  ;;  %v1946_v22 = vmul.f32 %v3082_v49, %v790_v19  ;;  %v1945_v24 = vmul.f32 %v3082_v49, %v783_v21  ;;  %v1291_v19 = vrot.slane %v37_v10, %v2688_v6 }
 0x14c   :  { %1195 = vbcast.lane.b32.xlu1 %v1193_v13, 256  ;;  %1188 = vbcast.lane.b32.xlu0 %v1186_v14, 256  ;;  %v1284_v21 = vrot.slane %v37_v10, %v2684_v4 }
 0x14d   :  { %v2202_v27 = vadd.f32 %v3073_v45, %v1946_v22  ;;  %v2201_v28 = vadd.f32 %v3073_v45, %v1945_v24 }
 0x14e   :  { %v804_v29 = vpop.permute.xlu1 %803  ;;  %v797_v30 = vpop.permute.xlu0 %796 }
 0x14f   :  { %2458 = vst [vmem:[#allocation2 + $0x348] sm:$0xff] %v2202_v27  ;;  %2457 = vst [vmem:[#allocation2 + $0x340] sm:$0xff] %v2201_v28  ;;  %v1948_v31 = vmul.f32 %v3082_v49, %v804_v29  ;;  %v1947_v32 = vmul.f32 %v3082_v49, %v797_v30  ;;  %v1305_v29 = vrot.slane %v37_v10, %v2686_v5 }
 0x150   :  { %1209 = vbcast.lane.b32.xlu1 %v1207_v25, 256  ;;  %1202 = vbcast.lane.b32.xlu0 %v1200_v26, 256  ;;  %v1298_v30 = vrot.slane %v37_v10, %v2682_v3 }
 0x151   :  { %v2204_v35 = vadd.f32 %v3073_v45, %v1948_v31  ;;  %v2203_v36 = vadd.f32 %v3073_v45, %v1947_v32 }
 0x152   :  { %v818_v38 = vpop.permute.xlu1 %817  ;;  %v811_v39 = vpop.permute.xlu0 %810 }
 0x153   :  { %2460 = vst [vmem:[#allocation2 + $0x358] sm:$0xff] %v2204_v35  ;;  %2459 = vst [vmem:[#allocation2 + $0x350] sm:$0xff] %v2203_v36  ;;  %v1950_v40 = vmul.f32 %v3082_v49, %v818_v38  ;;  %v1949_v41 = vmul.f32 %v3082_v49, %v811_v39  ;;  %v1312_v38 = vrot.slane %v37_v10, %v2696_v12 }
 0x154   :  { %1223 = vbcast.lane.b32.xlu1 %v1221_v33, 256  ;;  %1216 = vbcast.lane.b32.xlu0 %v1214_v34, 256 }
 0x155   :  { %v2206_v44 = vadd.f32 %v3073_v45, %v1950_v40  ;;  %v2205_v46 = vadd.f32 %v3073_v45, %v1949_v41 }
 0x156   :  { %v832_v47 = vpop.permute.xlu1 %831  ;;  %v825_v20 = vpop.permute.xlu0 %824 }
 0x157   :  { %2462 = vst [vmem:[#allocation2 + $0x368] sm:$0xff] %v2206_v44  ;;  %2461 = vst [vmem:[#allocation2 + $0x360] sm:$0xff] %v2205_v46  ;;  %v1952_v48 = vmul.f32 %v3082_v49, %v832_v47  ;;  %v1951_v23 = vmul.f32 %v3082_v49, %v825_v20  ;;  %v1333_v46 = vrot.slane %v37_v10, %v2700_v15 }
 0x158   :  { %1237 = vbcast.lane.b32.xlu1 %v1235_v42, 256  ;;  %1230 = vbcast.lane.b32.xlu0 %v1228_v43, 256  ;;  %v1326_v47 = vrot.slane %v37_v10, %v2702_v16 }
 0x159   :  { %v2208_v52 = vadd.f32 %v3073_v45, %v1952_v48  ;;  %v2207_v53 = vadd.f32 %v3073_v45, %v1951_v23  ;;  %v38_v23 = vld [vmem:[%s3601_s0 + $0xb8] sm:$0xff] }
 0x15a   :  { %v846_v54 = vpop.permute.xlu1 %845  ;;  %v839_v55 = vpop.permute.xlu0 %838  ;;  %v1375_v10 = vrot.slane %v38_v23, %v2694_v11 }
 0x15b   :  { %2464 = vst [vmem:[#allocation2 + $0x378] sm:$0xff] %v2208_v52  ;;  %2463 = vst [vmem:[#allocation2 + $0x370] sm:$0xff] %v2207_v53  ;;  %v1954_v56 = vmul.f32 %v3082_v49, %v846_v54  ;;  %v1953_v57 = vmul.f32 %v3082_v49, %v839_v55  ;;  %v1347_v54 = vrot.slane %v38_v23, %v2688_v6 }
 0x15c   :  { %1251 = vbcast.lane.b32.xlu1 %v1249_v50, 256  ;;  %1244 = vbcast.lane.b32.xlu0 %v1242_v51, 256  ;;  %v1340_v55 = vrot.slane %v38_v23, %v2684_v4 }
 0x15d   :  { %v2210_v60 = vadd.f32 %v3073_v45, %v1954_v56  ;;  %v2209_v61 = vadd.f32 %v3073_v45, %v1953_v57 }
 0x15e   :  { %v860_v62 = vpop.permute.xlu1 %859  ;;  %v853_v63 = vpop.permute.xlu0 %852 }
 0x15f   :  { %2466 = vst [vmem:[#allocation2 + $0x388] sm:$0xff] %v2210_v60  ;;  %2465 = vst [vmem:[#allocation2 + $0x380] sm:$0xff] %v2209_v61  ;;  %v1956_v0 = vmul.f32 %v3082_v49, %v860_v62  ;;  %v1955_v1 = vmul.f32 %v3082_v49, %v853_v63  ;;  %v1361_v62 = vrot.slane %v38_v23, %v2686_v5 }
 0x160   :  { %1265 = vbcast.lane.b32.xlu1 %v1263_v58, 256  ;;  %1258 = vbcast.lane.b32.xlu0 %v1256_v59, 256  ;;  %v1354_v63 = vrot.slane %v38_v23, %v2682_v3 }
 0x161   :  { %v2212_v8 = vadd.f32 %v3073_v45, %v1956_v0  ;;  %v2211_v9 = vadd.f32 %v3073_v45, %v1955_v1 }
 0x162   :  { %v874_v13 = vpop.permute.xlu1 %873  ;;  %v867_v14 = vpop.permute.xlu0 %866 }
 0x163   :  { %2468 = vst [vmem:[#allocation2 + $0x398] sm:$0xff] %v2212_v8  ;;  %2467 = vst [vmem:[#allocation2 + $0x390] sm:$0xff] %v2211_v9  ;;  %v1958_v17 = vmul.f32 %v3082_v49, %v874_v13  ;;  %v1957_v18 = vmul.f32 %v3082_v49, %v867_v14  ;;  %v1368_v13 = vrot.slane %v38_v23, %v2696_v12 }
 0x164   :  { %1279 = vbcast.lane.b32.xlu1 %v1277_v2, 256  ;;  %1272 = vbcast.lane.b32.xlu0 %v1270_v7, 256 }
 0x165   :  { %v2214_v22 = vadd.f32 %v3073_v45, %v1958_v17  ;;  %v2213_v24 = vadd.f32 %v3073_v45, %v1957_v18 }
 0x166   :  { %v888_v25 = vpop.permute.xlu1 %887  ;;  %v881_v26 = vpop.permute.xlu0 %880 }
 0x167   :  { %2470 = vst [vmem:[#allocation2 + $0x3a8] sm:$0xff] %v2214_v22  ;;  %2469 = vst [vmem:[#allocation2 + $0x3a0] sm:$0xff] %v2213_v24  ;;  %v1960_v27 = vmul.f32 %v3082_v49, %v888_v25  ;;  %v1959_v28 = vmul.f32 %v3082_v49, %v881_v26  ;;  %v1389_v24 = vrot.slane %v38_v23, %v2700_v15 }
 0x168   :  { %1293 = vbcast.lane.b32.xlu1 %v1291_v19, 256  ;;  %1286 = vbcast.lane.b32.xlu0 %v1284_v21, 256  ;;  %v1382_v25 = vrot.slane %v38_v23, %v2702_v16 }
 0x169   :  { %v2216_v31 = vadd.f32 %v3073_v45, %v1960_v27  ;;  %v2215_v32 = vadd.f32 %v3073_v45, %v1959_v28  ;;  %v39_v28 = vld [vmem:[%s3601_s0 + $0xc0] sm:$0xff] }
 0x16a   :  { %v902_v33 = vpop.permute.xlu1 %901  ;;  %v895_v34 = vpop.permute.xlu0 %894  ;;  %v1431_v23 = vrot.slane %v39_v28, %v2694_v11 }
 0x16b   :  { %2472 = vst [vmem:[#allocation2 + $0x3b8] sm:$0xff] %v2216_v31  ;;  %2471 = vst [vmem:[#allocation2 + $0x3b0] sm:$0xff] %v2215_v32  ;;  %v1962_v35 = vmul.f32 %v3082_v49, %v902_v33  ;;  %v1961_v36 = vmul.f32 %v3082_v49, %v895_v34  ;;  %v1403_v33 = vrot.slane %v39_v28, %v2688_v6 }
 0x16c   :  { %1307 = vbcast.lane.b32.xlu1 %v1305_v29, 256  ;;  %1300 = vbcast.lane.b32.xlu0 %v1298_v30, 256  ;;  %v1396_v34 = vrot.slane %v39_v28, %v2684_v4 }
 0x16d   :  { %v2218_v39 = vadd.f32 %v3073_v45, %v1962_v35  ;;  %v2217_v40 = vadd.f32 %v3073_v45, %v1961_v36 }
 0x16e   :  { %v916_v41 = vpop.permute.xlu1 %915  ;;  %v909_v42 = vpop.permute.xlu0 %908 }
 0x16f   :  { %2474 = vst [vmem:[#allocation2 + $0x3c8] sm:$0xff] %v2218_v39  ;;  %2473 = vst [vmem:[#allocation2 + $0x3c0] sm:$0xff] %v2217_v40  ;;  %v1964_v43 = vmul.f32 %v3082_v49, %v916_v41  ;;  %v1963_v44 = vmul.f32 %v3082_v49, %v909_v42  ;;  %v1417_v41 = vrot.slane %v39_v28, %v2686_v5 }
 0x170   :  { %1321 = vbcast.lane.b32.xlu1 %v1319_v37, 256  ;;  %1314 = vbcast.lane.b32.xlu0 %v1312_v38, 256  ;;  %v1410_v42 = vrot.slane %v39_v28, %v2682_v3 }
 0x171   :  { %v2220_v20 = vadd.f32 %v3073_v45, %v1964_v43  ;;  %v2219_v48 = vadd.f32 %v3073_v45, %v1963_v44 }
 0x172   :  { %v930_v50 = vpop.permute.xlu1 %929  ;;  %v923_v51 = vpop.permute.xlu0 %922 }
 0x173   :  { %2476 = vst [vmem:[#allocation2 + $0x3d8] sm:$0xff] %v2220_v20  ;;  %2475 = vst [vmem:[#allocation2 + $0x3d0] sm:$0xff] %v2219_v48  ;;  %v1966_v52 = vmul.f32 %v3082_v49, %v930_v50  ;;  %v1965_v53 = vmul.f32 %v3082_v49, %v923_v51  ;;  %v1424_v50 = vrot.slane %v39_v28, %v2696_v12 }
 0x174   :  { %1335 = vbcast.lane.b32.xlu1 %v1333_v46, 256  ;;  %1328 = vbcast.lane.b32.xlu0 %v1326_v47, 256 }
 0x175   :  { %v2222_v56 = vadd.f32 %v3073_v45, %v1966_v52  ;;  %v2221_v57 = vadd.f32 %v3073_v45, %v1965_v53 }
 0x176   :  { %v944_v58 = vpop.permute.xlu1 %943  ;;  %v937_v59 = vpop.permute.xlu0 %936 }
 0x177   :  { %2478 = vst [vmem:[#allocation2 + $0x3e8] sm:$0xff] %v2222_v56  ;;  %2477 = vst [vmem:[#allocation2 + $0x3e0] sm:$0xff] %v2221_v57  ;;  %v1968_v60 = vmul.f32 %v3082_v49, %v944_v58  ;;  %v1967_v61 = vmul.f32 %v3082_v49, %v937_v59  ;;  %v1445_v57 = vrot.slane %v39_v28, %v2700_v15 }
 0x178   :  { %1349 = vbcast.lane.b32.xlu1 %v1347_v54, 256  ;;  %1342 = vbcast.lane.b32.xlu0 %v1340_v55, 256  ;;  %v1438_v58 = vrot.slane %v39_v28, %v2702_v16 }
 0x179   :  { %v2224_v0 = vadd.f32 %v3073_v45, %v1968_v60  ;;  %v2223_v1 = vadd.f32 %v3073_v45, %v1967_v61  ;;  %v40_v61 = vld [vmem:[%s3601_s0 + $0xc8] sm:$0xff] }
 0x17a   :  { %v958_v2 = vpop.permute.xlu1 %957  ;;  %v951_v7 = vpop.permute.xlu0 %950  ;;  %v1487_v28 = vrot.slane %v40_v61, %v2694_v11 }
 0x17b   :  { %2480 = vst [vmem:[#allocation2 + $0x3f8] sm:$0xff] %v2224_v0  ;;  %2479 = vst [vmem:[#allocation2 + $0x3f0] sm:$0xff] %v2223_v1  ;;  %v1970_v8 = vmul.f32 %v3082_v49, %v958_v2  ;;  %v1969_v9 = vmul.f32 %v3082_v49, %v951_v7  ;;  %v1459_v2 = vrot.slane %v40_v61, %v2688_v6 }
 0x17c   :  { %1363 = vbcast.lane.b32.xlu1 %v1361_v62, 256  ;;  %1356 = vbcast.lane.b32.xlu0 %v1354_v63, 256  ;;  %v1452_v7 = vrot.slane %v40_v61, %v2684_v4 }
 0x17d   :  { %v2226_v14 = vadd.f32 %v3073_v45, %v1970_v8  ;;  %v2225_v17 = vadd.f32 %v3073_v45, %v1969_v9 }
 0x17e   :  { %v972_v18 = vpop.permute.xlu1 %971  ;;  %v965_v19 = vpop.permute.xlu0 %964 }
 0x17f   :  { %2482 = vst [vmem:[#allocation2 + $0x408] sm:$0xff] %v2226_v14  ;;  %2481 = vst [vmem:[#allocation2 + $0x400] sm:$0xff] %v2225_v17  ;;  %v1972_v21 = vmul.f32 %v3082_v49, %v972_v18  ;;  %v1971_v22 = vmul.f32 %v3082_v49, %v965_v19  ;;  %v1473_v18 = vrot.slane %v40_v61, %v2686_v5 }
 0x180   :  { %1377 = vbcast.lane.b32.xlu1 %v1375_v10, 256  ;;  %1370 = vbcast.lane.b32.xlu0 %v1368_v13, 256  ;;  %v1466_v19 = vrot.slane %v40_v61, %v2682_v3 }
 0x181   :  { %v2228_v26 = vadd.f32 %v3073_v45, %v1972_v21  ;;  %v2227_v27 = vadd.f32 %v3073_v45, %v1971_v22 }
 0x182   :  { %v986_v29 = vpop.permute.xlu1 %985  ;;  %v979_v30 = vpop.permute.xlu0 %978 }
 0x183   :  { %2484 = vst [vmem:[#allocation2 + $0x418] sm:$0xff] %v2228_v26  ;;  %2483 = vst [vmem:[#allocation2 + $0x410] sm:$0xff] %v2227_v27  ;;  %v1974_v31 = vmul.f32 %v3082_v49, %v986_v29  ;;  %v1973_v32 = vmul.f32 %v3082_v49, %v979_v30  ;;  %v1480_v29 = vrot.slane %v40_v61, %v2696_v12 }
 0x184   :  { %1391 = vbcast.lane.b32.xlu1 %v1389_v24, 256  ;;  %1384 = vbcast.lane.b32.xlu0 %v1382_v25, 256 }
 0x185   :  { %v2230_v35 = vadd.f32 %v3073_v45, %v1974_v31  ;;  %v2229_v36 = vadd.f32 %v3073_v45, %v1973_v32 }
 0x186   :  { %v1000_v37 = vpop.permute.xlu1 %999  ;;  %v993_v38 = vpop.permute.xlu0 %992 }
 0x187   :  { %2486 = vst [vmem:[#allocation2 + $0x428] sm:$0xff] %v2230_v35  ;;  %2485 = vst [vmem:[#allocation2 + $0x420] sm:$0xff] %v2229_v36  ;;  %v1976_v39 = vmul.f32 %v3082_v49, %v1000_v37  ;;  %v1975_v40 = vmul.f32 %v3082_v49, %v993_v38  ;;  %v1501_v36 = vrot.slane %v40_v61, %v2700_v15 }
 0x188   :  { %1405 = vbcast.lane.b32.xlu1 %v1403_v33, 256  ;;  %1398 = vbcast.lane.b32.xlu0 %v1396_v34, 256  ;;  %v1494_v37 = vrot.slane %v40_v61, %v2702_v16 }
 0x189   :  { %v2232_v43 = vadd.f32 %v3073_v45, %v1976_v39  ;;  %v2231_v44 = vadd.f32 %v3073_v45, %v1975_v40  ;;  %v41_v40 = vld [vmem:[%s3601_s0 + $0xd0] sm:$0xff] }
 0x18a   :  { %v1014_v46 = vpop.permute.xlu1 %1013  ;;  %v1007_v47 = vpop.permute.xlu0 %1006  ;;  %v1543_v61 = vrot.slane %v41_v40, %v2694_v11 }
 0x18b   :  { %2488 = vst [vmem:[#allocation2 + $0x438] sm:$0xff] %v2232_v43  ;;  %2487 = vst [vmem:[#allocation2 + $0x430] sm:$0xff] %v2231_v44  ;;  %v1978_v20 = vmul.f32 %v3082_v49, %v1014_v46  ;;  %v1977_v48 = vmul.f32 %v3082_v49, %v1007_v47  ;;  %v1515_v46 = vrot.slane %v41_v40, %v2688_v6 }
 0x18c   :  { %1419 = vbcast.lane.b32.xlu1 %v1417_v41, 256  ;;  %1412 = vbcast.lane.b32.xlu0 %v1410_v42, 256  ;;  %v1508_v47 = vrot.slane %v41_v40, %v2684_v4 }
 0x18d   :  { %v2234_v51 = vadd.f32 %v3073_v45, %v1978_v20  ;;  %v2233_v52 = vadd.f32 %v3073_v45, %v1977_v48 }
 0x18e   :  { %v1028_v53 = vpop.permute.xlu1 %1027  ;;  %v1021_v54 = vpop.permute.xlu0 %1020 }
 0x18f   :  { %2490 = vst [vmem:[#allocation2 + $0x448] sm:$0xff] %v2234_v51  ;;  %2489 = vst [vmem:[#allocation2 + $0x440] sm:$0xff] %v2233_v52  ;;  %v1980_v55 = vmul.f32 %v3082_v49, %v1028_v53  ;;  %v1979_v56 = vmul.f32 %v3082_v49, %v1021_v54  ;;  %v1529_v53 = vrot.slane %v41_v40, %v2686_v5 }
 0x190   :  { %1433 = vbcast.lane.b32.xlu1 %v1431_v23, 256  ;;  %1426 = vbcast.lane.b32.xlu0 %v1424_v50, 256  ;;  %v1522_v54 = vrot.slane %v41_v40, %v2682_v3 }
 0x191   :  { %v2236_v59 = vadd.f32 %v3073_v45, %v1980_v55  ;;  %v2235_v60 = vadd.f32 %v3073_v45, %v1979_v56 }
 0x192   :  { %v1042_v62 = vpop.permute.xlu1 %1041  ;;  %v1035_v63 = vpop.permute.xlu0 %1034 }
 0x193   :  { %2492 = vst [vmem:[#allocation2 + $0x458] sm:$0xff] %v2236_v59  ;;  %2491 = vst [vmem:[#allocation2 + $0x450] sm:$0xff] %v2235_v60  ;;  %v1982_v0 = vmul.f32 %v3082_v49, %v1042_v62  ;;  %v1981_v1 = vmul.f32 %v3082_v49, %v1035_v63  ;;  %v1536_v62 = vrot.slane %v41_v40, %v2696_v12 }
 0x194   :  { %1447 = vbcast.lane.b32.xlu1 %v1445_v57, 256  ;;  %1440 = vbcast.lane.b32.xlu0 %v1438_v58, 256 }
 0x195   :  { %v2238_v8 = vadd.f32 %v3073_v45, %v1982_v0  ;;  %v2237_v9 = vadd.f32 %v3073_v45, %v1981_v1 }
 0x196   :  { %v1056_v10 = vpop.permute.xlu1 %1055  ;;  %v1049_v13 = vpop.permute.xlu0 %1048 }
 0x197   :  { %2494 = vst [vmem:[#allocation2 + $0x468] sm:$0xff] %v2238_v8  ;;  %2493 = vst [vmem:[#allocation2 + $0x460] sm:$0xff] %v2237_v9  ;;  %v1984_v14 = vmul.f32 %v3082_v49, %v1056_v10  ;;  %v1983_v17 = vmul.f32 %v3082_v49, %v1049_v13  ;;  %v1557_v9 = vrot.slane %v41_v40, %v2700_v15 }
 0x198   :  { %1461 = vbcast.lane.b32.xlu1 %v1459_v2, 256  ;;  %1454 = vbcast.lane.b32.xlu0 %v1452_v7, 256  ;;  %v1550_v10 = vrot.slane %v41_v40, %v2702_v16 }
 0x199   :  { %v2240_v21 = vadd.f32 %v3073_v45, %v1984_v14  ;;  %v2239_v22 = vadd.f32 %v3073_v45, %v1983_v17  ;;  %v42_v17 = vld [vmem:[%s3601_s0 + $0xd8] sm:$0xff] }
 0x19a   :  { %v1070_v24 = vpop.permute.xlu1 %1069  ;;  %v1063_v25 = vpop.permute.xlu0 %1062  ;;  %v1599_v40 = vrot.slane %v42_v17, %v2694_v11 }
 0x19b   :  { %2496 = vst [vmem:[#allocation2 + $0x478] sm:$0xff] %v2240_v21  ;;  %2495 = vst [vmem:[#allocation2 + $0x470] sm:$0xff] %v2239_v22  ;;  %v1986_v26 = vmul.f32 %v3082_v49, %v1070_v24  ;;  %v1985_v27 = vmul.f32 %v3082_v49, %v1063_v25  ;;  %v1571_v24 = vrot.slane %v42_v17, %v2688_v6 }
 0x19c   :  { %1475 = vbcast.lane.b32.xlu1 %v1473_v18, 256  ;;  %1468 = vbcast.lane.b32.xlu0 %v1466_v19, 256  ;;  %v1564_v25 = vrot.slane %v42_v17, %v2684_v4 }
 0x19d   :  { %v2242_v30 = vadd.f32 %v3073_v45, %v1986_v26  ;;  %v2241_v31 = vadd.f32 %v3073_v45, %v1985_v27 }
 0x19e   :  { %v1084_v32 = vpop.permute.xlu1 %1083  ;;  %v1077_v33 = vpop.permute.xlu0 %1076 }
 0x19f   :  { %2498 = vst [vmem:[#allocation2 + $0x488] sm:$0xff] %v2242_v30  ;;  %2497 = vst [vmem:[#allocation2 + $0x480] sm:$0xff] %v2241_v31  ;;  %v1988_v34 = vmul.f32 %v3082_v49, %v1084_v32  ;;  %v1987_v35 = vmul.f32 %v3082_v49, %v1077_v33  ;;  %v1585_v32 = vrot.slane %v42_v17, %v2686_v5 }
 0x1a0   :  { %1489 = vbcast.lane.b32.xlu1 %v1487_v28, 256  ;;  %1482 = vbcast.lane.b32.xlu0 %v1480_v29, 256  ;;  %v1578_v33 = vrot.slane %v42_v17, %v2682_v3 }
 0x1a1   :  { %v2244_v38 = vadd.f32 %v3073_v45, %v1988_v34  ;;  %v2243_v39 = vadd.f32 %v3073_v45, %v1987_v35 }
 0x1a2   :  { %v1098_v41 = vpop.permute.xlu1 %1097  ;;  %v1091_v42 = vpop.permute.xlu0 %1090 }
 0x1a3   :  { %2500 = vst [vmem:[#allocation2 + $0x498] sm:$0xff] %v2244_v38  ;;  %2499 = vst [vmem:[#allocation2 + $0x490] sm:$0xff] %v2243_v39  ;;  %v1990_v43 = vmul.f32 %v3082_v49, %v1098_v41  ;;  %v1989_v44 = vmul.f32 %v3082_v49, %v1091_v42  ;;  %v1592_v41 = vrot.slane %v42_v17, %v2696_v12 }
 0x1a4   :  { %1503 = vbcast.lane.b32.xlu1 %v1501_v36, 256  ;;  %1496 = vbcast.lane.b32.xlu0 %v1494_v37, 256 }
 0x1a5   :  { %v2246_v20 = vadd.f32 %v3073_v45, %v1990_v43  ;;  %v2245_v48 = vadd.f32 %v3073_v45, %v1989_v44 }
 0x1a6   :  { %v1112_v23 = vpop.permute.xlu1 %1111  ;;  %v1105_v50 = vpop.permute.xlu0 %1104 }
 0x1a7   :  { %2502 = vst [vmem:[#allocation2 + $0x4a8] sm:$0xff] %v2246_v20  ;;  %2501 = vst [vmem:[#allocation2 + $0x4a0] sm:$0xff] %v2245_v48  ;;  %v1992_v51 = vmul.f32 %v3082_v49, %v1112_v23  ;;  %v1991_v52 = vmul.f32 %v3082_v49, %v1105_v50  ;;  %v1613_v48 = vrot.slane %v42_v17, %v2700_v15 }
 0x1a8   :  { %1517 = vbcast.lane.b32.xlu1 %v1515_v46, 256  ;;  %1510 = vbcast.lane.b32.xlu0 %v1508_v47, 256  ;;  %v1606_v23 = vrot.slane %v42_v17, %v2702_v16 }
 0x1a9   :  { %v2248_v55 = vadd.f32 %v3073_v45, %v1992_v51  ;;  %v2247_v56 = vadd.f32 %v3073_v45, %v1991_v52  ;;  %v43_v52 = vld [vmem:[%s3601_s0 + $0xe0] sm:$0xff] }
 0x1aa   :  { %v1126_v57 = vpop.permute.xlu1 %1125  ;;  %v1119_v58 = vpop.permute.xlu0 %1118  ;;  %v1655_v17 = vrot.slane %v43_v52, %v2694_v11 }
 0x1ab   :  { %2504 = vst [vmem:[#allocation2 + $0x4b8] sm:$0xff] %v2248_v55  ;;  %2503 = vst [vmem:[#allocation2 + $0x4b0] sm:$0xff] %v2247_v56  ;;  %v1994_v59 = vmul.f32 %v3082_v49, %v1126_v57  ;;  %v1993_v60 = vmul.f32 %v3082_v49, %v1119_v58  ;;  %v1627_v57 = vrot.slane %v43_v52, %v2688_v6 }
 0x1ac   :  { %1531 = vbcast.lane.b32.xlu1 %v1529_v53, 256  ;;  %1524 = vbcast.lane.b32.xlu0 %v1522_v54, 256  ;;  %v1620_v58 = vrot.slane %v43_v52, %v2684_v4 }
 0x1ad   :  { %v2250_v63 = vadd.f32 %v3073_v45, %v1994_v59  ;;  %v2249_v0 = vadd.f32 %v3073_v45, %v1993_v60 }
 0x1ae   :  { %v1140_v1 = vpop.permute.xlu1 %1139  ;;  %v1133_v2 = vpop.permute.xlu0 %1132 }
 0x1af   :  { %2506 = vst [vmem:[#allocation2 + $0x4c8] sm:$0xff] %v2250_v63  ;;  %2505 = vst [vmem:[#allocation2 + $0x4c0] sm:$0xff] %v2249_v0  ;;  %v1996_v7 = vmul.f32 %v3082_v49, %v1140_v1  ;;  %v1995_v8 = vmul.f32 %v3082_v49, %v1133_v2  ;;  %v1641_v1 = vrot.slane %v43_v52, %v2686_v5 }
 0x1b0   :  { %1545 = vbcast.lane.b32.xlu1 %v1543_v61, 256  ;;  %1538 = vbcast.lane.b32.xlu0 %v1536_v62, 256  ;;  %v1634_v2 = vrot.slane %v43_v52, %v2682_v3 }
 0x1b1   :  { %v2252_v13 = vadd.f32 %v3073_v45, %v1996_v7  ;;  %v2251_v14 = vadd.f32 %v3073_v45, %v1995_v8  ;;  %v3367_v7 = vld [vmem:[%s3603_s2] sm:$0xff] }
 0x1b2   :  { %v1154_v18 = vpop.permute.xlu1 %1153  ;;  %v1147_v19 = vpop.permute.xlu0 %1146 }
 0x1b3   :  { %2508 = vst [vmem:[#allocation2 + $0x4d8] sm:$0xff] %v2252_v13  ;;  %2507 = vst [vmem:[#allocation2 + $0x4d0] sm:$0xff] %v2251_v14  ;;  %v1998_v21 = vmul.f32 %v3082_v49, %v1154_v18  ;;  %v1997_v22 = vmul.f32 %v3082_v49, %v1147_v19  ;;  %v1648_v18 = vrot.slane %v43_v52, %v2696_v12 }
 0x1b4   :  { %1559 = vbcast.lane.b32.xlu1 %v1557_v9, 256  ;;  %1552 = vbcast.lane.b32.xlu0 %v1550_v10, 256 }
 0x1b5   :  { %v2254_v26 = vadd.f32 %v3073_v45, %v1998_v21  ;;  %v2253_v27 = vadd.f32 %v3073_v45, %v1997_v22 }
 0x1b6   :  { %v1168_v28 = vpop.permute.xlu1 %1167  ;;  %v1161_v29 = vpop.permute.xlu0 %1160 }
 0x1b7   :  { %2510 = vst [vmem:[#allocation2 + $0x4e8] sm:$0xff] %v2254_v26  ;;  %2509 = vst [vmem:[#allocation2 + $0x4e0] sm:$0xff] %v2253_v27  ;;  %v2000_v30 = vmul.f32 %v3082_v49, %v1168_v28  ;;  %v1999_v31 = vmul.f32 %v3082_v49, %v1161_v29  ;;  %v1669_v27 = vrot.slane %v43_v52, %v2700_v15 }
 0x1b8   :  { %1573 = vbcast.lane.b32.xlu1 %v1571_v24, 256  ;;  %1566 = vbcast.lane.b32.xlu0 %v1564_v25, 256  ;;  %v1662_v28 = vrot.slane %v43_v52, %v2702_v16 }
 0x1b9   :  { %v2256_v34 = vadd.f32 %v3073_v45, %v2000_v30  ;;  %v2255_v35 = vadd.f32 %v3073_v45, %v1999_v31  ;;  %v44_v31 = vld [vmem:[%s3601_s0 + $0xe8] sm:$0xff] }
 0x1ba   :  { %v1182_v36 = vpop.permute.xlu1 %1181  ;;  %v1175_v37 = vpop.permute.xlu0 %1174  ;;  %v1711_v52 = vrot.slane %v44_v31, %v2694_v11 }
 0x1bb   :  { %2512 = vst [vmem:[#allocation2 + $0x4f8] sm:$0xff] %v2256_v34  ;;  %2511 = vst [vmem:[#allocation2 + $0x4f0] sm:$0xff] %v2255_v35  ;;  %v2002_v38 = vmul.f32 %v3082_v49, %v1182_v36  ;;  %v2001_v39 = vmul.f32 %v3082_v49, %v1175_v37  ;;  %v1683_v36 = vrot.slane %v44_v31, %v2688_v6 }
 0x1bc   :  { %1587 = vbcast.lane.b32.xlu1 %v1585_v32, 256  ;;  %1580 = vbcast.lane.b32.xlu0 %v1578_v33, 256  ;;  %v1676_v37 = vrot.slane %v44_v31, %v2684_v4 }
 0x1bd   :  { %v2258_v42 = vadd.f32 %v3073_v45, %v2002_v38  ;;  %v2257_v43 = vadd.f32 %v3073_v45, %v2001_v39 }
 0x1be   :  { %v1196_v44 = vpop.permute.xlu1 %1195  ;;  %v1189_v46 = vpop.permute.xlu0 %1188 }
 0x1bf   :  { %2514 = vst [vmem:[#allocation2 + $0x508] sm:$0xff] %v2258_v42  ;;  %2513 = vst [vmem:[#allocation2 + $0x500] sm:$0xff] %v2257_v43  ;;  %v2004_v47 = vmul.f32 %v3082_v49, %v1196_v44  ;;  %v2003_v20 = vmul.f32 %v3082_v49, %v1189_v46  ;;  %v1697_v44 = vrot.slane %v44_v31, %v2686_v5 }
 0x1c0   :  { %1601 = vbcast.lane.b32.xlu1 %v1599_v40, 256  ;;  %1594 = vbcast.lane.b32.xlu0 %v1592_v41, 256  ;;  %v1690_v46 = vrot.slane %v44_v31, %v2682_v3 }
 0x1c1   :  { %v2260_v50 = vadd.f32 %v3073_v45, %v2004_v47  ;;  %v2259_v51 = vadd.f32 %v3073_v45, %v2003_v20 }
 0x1c2   :  { %v1210_v53 = vpop.permute.xlu1 %1209  ;;  %v1203_v54 = vpop.permute.xlu0 %1202 }
 0x1c3   :  { %2516 = vst [vmem:[#allocation2 + $0x518] sm:$0xff] %v2260_v50  ;;  %2515 = vst [vmem:[#allocation2 + $0x510] sm:$0xff] %v2259_v51  ;;  %v2006_v55 = vmul.f32 %v3082_v49, %v1210_v53  ;;  %v2005_v56 = vmul.f32 %v3082_v49, %v1203_v54  ;;  %v1704_v53 = vrot.slane %v44_v31, %v2696_v12 }
 0x1c4   :  { %1615 = vbcast.lane.b32.xlu1 %v1613_v48, 256  ;;  %1608 = vbcast.lane.b32.xlu0 %v1606_v23, 256 }
 0x1c5   :  { %v2262_v59 = vadd.f32 %v3073_v45, %v2006_v55  ;;  %v2261_v60 = vadd.f32 %v3073_v45, %v2005_v56 }
 0x1c6   :  { %v1224_v61 = vpop.permute.xlu1 %1223  ;;  %v1217_v62 = vpop.permute.xlu0 %1216 }
 0x1c7   :  { %2518 = vst [vmem:[#allocation2 + $0x528] sm:$0xff] %v2262_v59  ;;  %2517 = vst [vmem:[#allocation2 + $0x520] sm:$0xff] %v2261_v60  ;;  %v2008_v63 = vmul.f32 %v3082_v49, %v1224_v61  ;;  %v2007_v0 = vmul.f32 %v3082_v49, %v1217_v62  ;;  %v3374_v49 = vld [vmem:[%s3602_s1] sm:$0xff]  ;;  %v1725_v60 = vrot.slane %v44_v31, %v2700_v15 }
 0x1c8   :  { %1629 = vbcast.lane.b32.xlu1 %v1627_v57, 256  ;;  %1622 = vbcast.lane.b32.xlu0 %v1620_v58, 256  ;;  %v1718_v61 = vrot.slane %v44_v31, %v2702_v16 }
 0x1c9   :  { %v2264_v45 = vadd.f32 %v3367_v7, %v2008_v63  ;;  %v2263_v8 = vadd.f32 %v3367_v7, %v2007_v0  ;;  %v45_v0 = vld [vmem:[%s3601_s0 + $0xf0] sm:$0xff] }
 0x1ca   :  { %v1238_v9 = vpop.permute.xlu1 %1237  ;;  %v1231_v10 = vpop.permute.xlu0 %1230  ;;  %v1767_v31 = vrot.slane %v45_v0, %v2694_v11 }
 0x1cb   :  { %2520 = vst [vmem:[#allocation2 + $0x538] sm:$0xff] %v2264_v45  ;;  %2519 = vst [vmem:[#allocation2 + $0x530] sm:$0xff] %v2263_v8  ;;  %v2010_v13 = vmul.f32 %v3374_v49, %v1238_v9  ;;  %v2009_v14 = vmul.f32 %v3374_v49, %v1231_v10  ;;  %v1739_v9 = vrot.slane %v45_v0, %v2688_v6 }
 0x1cc   :  { %1643 = vbcast.lane.b32.xlu1 %v1641_v1, 256  ;;  %1636 = vbcast.lane.b32.xlu0 %v1634_v2, 256  ;;  %v1732_v10 = vrot.slane %v45_v0, %v2684_v4 }
 0x1cd   :  { %v2266_v19 = vadd.f32 %v3367_v7, %v2010_v13  ;;  %v2265_v21 = vadd.f32 %v3367_v7, %v2009_v14 }
 0x1ce   :  { %v1252_v22 = vpop.permute.xlu1 %1251  ;;  %v1245_v24 = vpop.permute.xlu0 %1244 }
 0x1cf   :  { %2522 = vst [vmem:[#allocation2 + $0x548] sm:$0xff] %v2266_v19  ;;  %2521 = vst [vmem:[#allocation2 + $0x540] sm:$0xff] %v2265_v21  ;;  %v2012_v25 = vmul.f32 %v3374_v49, %v1252_v22  ;;  %v2011_v26 = vmul.f32 %v3374_v49, %v1245_v24  ;;  %v1753_v22 = vrot.slane %v45_v0, %v2686_v5 }
 0x1d0   :  { %1657 = vbcast.lane.b32.xlu1 %v1655_v17, 256  ;;  %1650 = vbcast.lane.b32.xlu0 %v1648_v18, 256  ;;  %v1746_v24 = vrot.slane %v45_v0, %v2682_v3 }
 0x1d1   :  { %v2268_v29 = vadd.f32 %v3367_v7, %v2012_v25  ;;  %v2267_v30 = vadd.f32 %v3367_v7, %v2011_v26 }
 0x1d2   :  { %v1266_v32 = vpop.permute.xlu1 %1265  ;;  %v1259_v33 = vpop.permute.xlu0 %1258 }
 0x1d3   :  { %2524 = vst [vmem:[#allocation2 + $0x558] sm:$0xff] %v2268_v29  ;;  %2523 = vst [vmem:[#allocation2 + $0x550] sm:$0xff] %v2267_v30  ;;  %v2014_v34 = vmul.f32 %v3374_v49, %v1266_v32  ;;  %v2013_v35 = vmul.f32 %v3374_v49, %v1259_v33  ;;  %v1760_v32 = vrot.slane %v45_v0, %v2696_v12 }
 0x1d4   :  { %1671 = vbcast.lane.b32.xlu1 %v1669_v27, 256  ;;  %1664 = vbcast.lane.b32.xlu0 %v1662_v28, 256 }
 0x1d5   :  { %v2270_v38 = vadd.f32 %v3367_v7, %v2014_v34  ;;  %v2269_v39 = vadd.f32 %v3367_v7, %v2013_v35 }
 0x1d6   :  { %v1280_v40 = vpop.permute.xlu1 %1279  ;;  %v1273_v41 = vpop.permute.xlu0 %1272 }
 0x1d7   :  { %2526 = vst [vmem:[#allocation2 + $0x568] sm:$0xff] %v2270_v38  ;;  %2525 = vst [vmem:[#allocation2 + $0x560] sm:$0xff] %v2269_v39  ;;  %v2016_v42 = vmul.f32 %v3374_v49, %v1280_v40  ;;  %v2015_v43 = vmul.f32 %v3374_v49, %v1273_v41  ;;  %v1781_v39 = vrot.slane %v45_v0, %v2700_v15 }
 0x1d8   :  { %1685 = vbcast.lane.b32.xlu1 %v1683_v36, 256  ;;  %1678 = vbcast.lane.b32.xlu0 %v1676_v37, 256  ;;  %v1774_v40 = vrot.slane %v45_v0, %v2702_v16 }
 0x1d9   :  { %v2272_v47 = vadd.f32 %v3367_v7, %v2016_v42  ;;  %v2271_v20 = vadd.f32 %v3367_v7, %v2015_v43  ;;  %v46_v43 = vld [vmem:[%s3601_s0 + $0xf8] sm:$0xff]  ;;  %s2656_s0 = smov [#allocation2]  }
 0x1da   :  { %v1294_v48 = vpop.permute.xlu1 %1293  ;;  %v1287_v23 = vpop.permute.xlu0 %1286  ;;  %s2614_s5 = sshll.u32 %s2656_s0, 4  ;;  %s2615_s5 = int_to_ptr.vmem [resolvable:$true] %s2614_s5 }
 0x1db   :  { %2528 = vst [vmem:[#allocation2 + $0x578] sm:$0xff] %v2272_v47  ;;  %2527 = vst [vmem:[#allocation2 + $0x570] sm:$0xff] %v2271_v20  ;;  %v2018_v50 = vmul.f32 %v3374_v49, %v1294_v48  ;;  %v2017_v51 = vmul.f32 %v3374_v49, %v1287_v23  ;;  %v1795_v48 = vrot.slane %v46_v43, %v2688_v6  ;;  %s2632_s6 = scalar_lea.vmem %s2615_s5, 32768  ;;  %p2637_p1 = scmp.lt.s32.totalorder %s2615_s5, %s2615_s5 }
 0x1dc   :  { %1699 = vbcast.lane.b32.xlu1 %v1697_v44, 256  ;;  %1692 = vbcast.lane.b32.xlu0 %v1690_v46, 256  ;;  %v1788_v23 = vrot.slane %v46_v43, %v2684_v4  ;;  %v1802_v6 = vrot.slane %v46_v43, %v2682_v3  ;;  %p2633_p0 = scmp.ne.s32.totalorder %s2615_s5, %s2632_s6  ;;  %p2638_p2 = scmp.lt.s32.totalorder %s2632_s6, %s2632_s6 }
 0x1dd   :  { %v2274_v54 = vadd.f32 %v3367_v7, %v2018_v50  ;;  %v2273_v55 = vadd.f32 %v3367_v7, %v2017_v51 }
 0x1de   :  { %v1308_v56 = vpop.permute.xlu1 %1307  ;;  %v1301_v57 = vpop.permute.xlu0 %1300  ;;  %p2639_p3 = por %p2638_p2, %p2637_p1 }
 0x1df   :  { %2530 = vst [vmem:[#allocation2 + $0x588] sm:$0xff] %v2274_v54  ;;  %2529 = vst [vmem:[#allocation2 + $0x580] sm:$0xff] %v2273_v55  ;;  %v2020_v58 = vmul.f32 %v3374_v49, %v1308_v56  ;;  %v2019_v59 = vmul.f32 %v3374_v49, %v1301_v57  ;;  %v1809_v56 = vrot.slane %v46_v43, %v2686_v5 }
 0x1e0   :  { %1713 = vbcast.lane.b32.xlu1 %v1711_v52, 256  ;;  %1706 = vbcast.lane.b32.xlu0 %v1704_v53, 256  ;;  %v1816_v5 = vrot.slane %v46_v43, %v2696_v12  ;;  %p2640_p4 = pnand %p2639_p3, %p2633_p0 }
 0x1e1   :  { %v2276_v62 = vadd.f32 %v3367_v7, %v2020_v58  ;;  %v2275_v63 = vadd.f32 %v3367_v7, %v2019_v59 }
 0x1e2   :  { %v1322_v1 = vpop.permute.xlu1 %1321  ;;  %v1315_v2 = vpop.permute.xlu0 %1314 }
 0x1e3   :  { %2532 = vst [vmem:[#allocation2 + $0x598] sm:$0xff] %v2276_v62  ;;  %2531 = vst [vmem:[#allocation2 + $0x590] sm:$0xff] %v2275_v63  ;;  %v2022_v45 = vmul.f32 %v3374_v49, %v1322_v1  ;;  %v2021_v8 = vmul.f32 %v3374_v49, %v1315_v2  ;;  %v1823_v62 = vrot.slane %v46_v43, %v2694_v11 }
 0x1e4   :  { %1727 = vbcast.lane.b32.xlu1 %v1725_v60, 256  ;;  %1720 = vbcast.lane.b32.xlu0 %v1718_v61, 256  ;;  %v1830_v11 = vrot.slane %v46_v43, %v2702_v16 }
 0x1e5   :  { %v2278_v13 = vadd.f32 %v3367_v7, %v2022_v45  ;;  %v2277_v14 = vadd.f32 %v3367_v7, %v2021_v8  ;;  %v1837_v8 = vrot.slane %v46_v43, %v2700_v15 }
 0x1e6   :  { %v1336_v17 = vpop.permute.xlu1 %1335  ;;  %v1329_v18 = vpop.permute.xlu0 %1328 }
 0x1e7   :  { %2534 = vst [vmem:[#allocation2 + $0x5a8] sm:$0xff] %v2278_v13  ;;  %2533 = vst [vmem:[#allocation2 + $0x5a0] sm:$0xff] %v2277_v14  ;;  %v2024_v19 = vmul.f32 %v3374_v49, %v1336_v17  ;;  %v2023_v21 = vmul.f32 %v3374_v49, %v1329_v18 }
 0x1e8   :  { %1741 = vbcast.lane.b32.xlu1 %v1739_v9, 256  ;;  %1734 = vbcast.lane.b32.xlu0 %v1732_v10, 256 }
 0x1e9   :  { %v2280_v25 = vadd.f32 %v3367_v7, %v2024_v19  ;;  %v2279_v26 = vadd.f32 %v3367_v7, %v2023_v21 }
 0x1ea   :  { %v1350_v27 = vpop.permute.xlu1 %1349  ;;  %v1343_v28 = vpop.permute.xlu0 %1342 }
 0x1eb   :  { %2536 = vst [vmem:[#allocation2 + $0x5b8] sm:$0xff] %v2280_v25  ;;  %2535 = vst [vmem:[#allocation2 + $0x5b0] sm:$0xff] %v2279_v26  ;;  %v2026_v29 = vmul.f32 %v3374_v49, %v1350_v27  ;;  %v2025_v30 = vmul.f32 %v3374_v49, %v1343_v28 }
 0x1ec   :  { %1755 = vbcast.lane.b32.xlu1 %v1753_v22, 256  ;;  %1748 = vbcast.lane.b32.xlu0 %v1746_v24, 256 }
 0x1ed   :  { %v2282_v33 = vadd.f32 %v3367_v7, %v2026_v29  ;;  %v2281_v34 = vadd.f32 %v3367_v7, %v2025_v30 }
 0x1ee   :  { %v1364_v35 = vpop.permute.xlu1 %1363  ;;  %v1357_v36 = vpop.permute.xlu0 %1356 }
 0x1ef   :  { %2538 = vst [vmem:[#allocation2 + $0x5c8] sm:$0xff] %v2282_v33  ;;  %2537 = vst [vmem:[#allocation2 + $0x5c0] sm:$0xff] %v2281_v34  ;;  %v2028_v37 = vmul.f32 %v3374_v49, %v1364_v35  ;;  %v2027_v38 = vmul.f32 %v3374_v49, %v1357_v36 }
 0x1f0   :  { %1769 = vbcast.lane.b32.xlu1 %v1767_v31, 256  ;;  %1762 = vbcast.lane.b32.xlu0 %v1760_v32, 256 }
 0x1f1   :  { %v2284_v41 = vadd.f32 %v3367_v7, %v2028_v37  ;;  %v2283_v42 = vadd.f32 %v3367_v7, %v2027_v38 }
 0x1f2   :  { %v1378_v44 = vpop.permute.xlu1 %1377  ;;  %v1371_v46 = vpop.permute.xlu0 %1370 }
 0x1f3   :  { %2540 = vst [vmem:[#allocation2 + $0x5d8] sm:$0xff] %v2284_v41  ;;  %2539 = vst [vmem:[#allocation2 + $0x5d0] sm:$0xff] %v2283_v42  ;;  %v2030_v47 = vmul.f32 %v3374_v49, %v1378_v44  ;;  %v2029_v20 = vmul.f32 %v3374_v49, %v1371_v46 }
 0x1f4   :  { %1783 = vbcast.lane.b32.xlu1 %v1781_v39, 256  ;;  %1776 = vbcast.lane.b32.xlu0 %v1774_v40, 256 }
 0x1f5   :  { %v2286_v50 = vadd.f32 %v3367_v7, %v2030_v47  ;;  %v2285_v51 = vadd.f32 %v3367_v7, %v2029_v20 }
 0x1f6   :  { %v1392_v52 = vpop.permute.xlu1 %1391  ;;  %v1385_v53 = vpop.permute.xlu0 %1384 }
 0x1f7   :  { %2542 = vst [vmem:[#allocation2 + $0x5e8] sm:$0xff] %v2286_v50  ;;  %2541 = vst [vmem:[#allocation2 + $0x5e0] sm:$0xff] %v2285_v51  ;;  %v2032_v54 = vmul.f32 %v3374_v49, %v1392_v52  ;;  %v2031_v55 = vmul.f32 %v3374_v49, %v1385_v53 }
 0x1f8   :  { %1797 = vbcast.lane.b32.xlu1 %v1795_v48, 256  ;;  %1790 = vbcast.lane.b32.xlu0 %v1788_v23, 256 }
 0x1f9   :  { %v2288_v4 = vadd.f32 %v3367_v7, %v2032_v54  ;;  %v2287_v57 = vadd.f32 %v3367_v7, %v2031_v55 }
 0x1fa   :  { %v1406_v58 = vpop.permute.xlu1 %1405  ;;  %v1399_v59 = vpop.permute.xlu0 %1398 }
 0x1fb   :  { %2544 = vst [vmem:[#allocation2 + $0x5f8] sm:$0xff] %v2288_v4  ;;  %2543 = vst [vmem:[#allocation2 + $0x5f0] sm:$0xff] %v2287_v57  ;;  %v2034_v60 = vmul.f32 %v3374_v49, %v1406_v58  ;;  %v2033_v61 = vmul.f32 %v3374_v49, %v1399_v59 }
 0x1fc   :  { %1811 = vbcast.lane.b32.xlu1 %v1809_v56, 256  ;;  %1804 = vbcast.lane.b32.xlu0 %v1802_v6, 256 }
 0x1fd   :  { %v2290_v3 = vadd.f32 %v3367_v7, %v2034_v60  ;;  %v2289_v63 = vadd.f32 %v3367_v7, %v2033_v61 }
 0x1fe   :  { %v1420_v0 = vpop.permute.xlu1 %1419  ;;  %v1413_v1 = vpop.permute.xlu0 %1412 }
 0x1ff   :  { %2546 = vst [vmem:[#allocation2 + $0x608] sm:$0xff] %v2290_v3  ;;  %2545 = vst [vmem:[#allocation2 + $0x600] sm:$0xff] %v2289_v63  ;;  %v2036_v2 = vmul.f32 %v3374_v49, %v1420_v0  ;;  %v2035_v45 = vmul.f32 %v3374_v49, %v1413_v1 }
 0x200   :  { %1825 = vbcast.lane.b32.xlu1 %v1823_v62, 256  ;;  %1818 = vbcast.lane.b32.xlu0 %v1816_v5, 256 }
 0x201   :  { %v2292_v12 = vadd.f32 %v3367_v7, %v2036_v2  ;;  %v2291_v9 = vadd.f32 %v3367_v7, %v2035_v45 }
 0x202   :  { %v1434_v10 = vpop.permute.xlu1 %1433  ;;  %v1427_v13 = vpop.permute.xlu0 %1426 }
 0x203   :  { %2548 = vst [vmem:[#allocation2 + $0x618] sm:$0xff] %v2292_v12  ;;  %2547 = vst [vmem:[#allocation2 + $0x610] sm:$0xff] %v2291_v9  ;;  %v2038_v14 = vmul.f32 %v3374_v49, %v1434_v10  ;;  %v2037_v17 = vmul.f32 %v3374_v49, %v1427_v13 }
 0x204   :  { %1839 = vbcast.lane.b32.xlu1 %v1837_v8, 256  ;;  %1832 = vbcast.lane.b32.xlu0 %v1830_v11, 256 }
 0x205   :  { %v2294_v18 = vadd.f32 %v3367_v7, %v2038_v14  ;;  %v2293_v15 = vadd.f32 %v3367_v7, %v2037_v17 }
 0x206   :  { %v1448_v19 = vpop.permute.xlu1 %1447  ;;  %v1441_v16 = vpop.permute.xlu0 %1440 }
 0x207   :  { %2550 = vst [vmem:[#allocation2 + $0x628] sm:$0xff] %v2294_v18  ;;  %2549 = vst [vmem:[#allocation2 + $0x620] sm:$0xff] %v2293_v15  ;;  %v2040_v21 = vmul.f32 %v3374_v49, %v1448_v19  ;;  %v2039_v22 = vmul.f32 %v3374_v49, %v1441_v16 }
 0x209   :  { %v2296_v24 = vadd.f32 %v3367_v7, %v2040_v21  ;;  %v2295_v25 = vadd.f32 %v3367_v7, %v2039_v22 }
 0x20a   :  { %v1462_v26 = vpop.permute.xlu1 %1461  ;;  %v1455_v27 = vpop.permute.xlu0 %1454 }
 0x20b   :  { %2552 = vst [vmem:[#allocation2 + $0x638] sm:$0xff] %v2296_v24  ;;  %2551 = vst [vmem:[#allocation2 + $0x630] sm:$0xff] %v2295_v25  ;;  %v2042_v28 = vmul.f32 %v3374_v49, %v1462_v26  ;;  %v2041_v29 = vmul.f32 %v3374_v49, %v1455_v27 }
 0x20d   :  { %v2298_v30 = vadd.f32 %v3367_v7, %v2042_v28  ;;  %v2297_v31 = vadd.f32 %v3367_v7, %v2041_v29 }
 0x20e   :  { %v1476_v32 = vpop.permute.xlu1 %1475  ;;  %v1469_v33 = vpop.permute.xlu0 %1468 }
 0x20f   :  { %2554 = vst [vmem:[#allocation2 + $0x648] sm:$0xff] %v2298_v30  ;;  %2553 = vst [vmem:[#allocation2 + $0x640] sm:$0xff] %v2297_v31  ;;  %v2044_v34 = vmul.f32 %v3374_v49, %v1476_v32  ;;  %v2043_v35 = vmul.f32 %v3374_v49, %v1469_v33 }
 0x211   :  { %v2300_v36 = vadd.f32 %v3367_v7, %v2044_v34  ;;  %v2299_v37 = vadd.f32 %v3367_v7, %v2043_v35 }
 0x212   :  { %v1490_v38 = vpop.permute.xlu1 %1489  ;;  %v1483_v39 = vpop.permute.xlu0 %1482 }
 0x213   :  { %2556 = vst [vmem:[#allocation2 + $0x658] sm:$0xff] %v2300_v36  ;;  %2555 = vst [vmem:[#allocation2 + $0x650] sm:$0xff] %v2299_v37  ;;  %v2046_v40 = vmul.f32 %v3374_v49, %v1490_v38  ;;  %v2045_v41 = vmul.f32 %v3374_v49, %v1483_v39 }
 0x215   :  { %v2302_v42 = vadd.f32 %v3367_v7, %v2046_v40  ;;  %v2301_v43 = vadd.f32 %v3367_v7, %v2045_v41 }
 0x216   :  { %v1504_v44 = vpop.permute.xlu1 %1503  ;;  %v1497_v46 = vpop.permute.xlu0 %1496 }
 0x217   :  { %2558 = vst [vmem:[#allocation2 + $0x668] sm:$0xff] %v2302_v42  ;;  %2557 = vst [vmem:[#allocation2 + $0x660] sm:$0xff] %v2301_v43  ;;  %v2048_v47 = vmul.f32 %v3374_v49, %v1504_v44  ;;  %v2047_v20 = vmul.f32 %v3374_v49, %v1497_v46 }
 0x219   :  { %v2304_v48 = vadd.f32 %v3367_v7, %v2048_v47  ;;  %v2303_v23 = vadd.f32 %v3367_v7, %v2047_v20 }
 0x21a   :  { %v1518_v50 = vpop.permute.xlu1 %1517  ;;  %v1511_v51 = vpop.permute.xlu0 %1510 }
 0x21b   :  { %2560 = vst [vmem:[#allocation2 + $0x678] sm:$0xff] %v2304_v48  ;;  %2559 = vst [vmem:[#allocation2 + $0x670] sm:$0xff] %v2303_v23  ;;  %v2050_v52 = vmul.f32 %v3374_v49, %v1518_v50  ;;  %v2049_v53 = vmul.f32 %v3374_v49, %v1511_v51 }
 0x21d   :  { %v2306_v54 = vadd.f32 %v3367_v7, %v2050_v52  ;;  %v2305_v55 = vadd.f32 %v3367_v7, %v2049_v53 }
 0x21e   :  { %v1532_v56 = vpop.permute.xlu1 %1531  ;;  %v1525_v6 = vpop.permute.xlu0 %1524 }
 0x21f   :  { %2562 = vst [vmem:[#allocation2 + $0x688] sm:$0xff] %v2306_v54  ;;  %2561 = vst [vmem:[#allocation2 + $0x680] sm:$0xff] %v2305_v55  ;;  %v2052_v4 = vmul.f32 %v3374_v49, %v1532_v56  ;;  %v2051_v57 = vmul.f32 %v3374_v49, %v1525_v6 }
 0x221   :  { %v2308_v58 = vadd.f32 %v3367_v7, %v2052_v4  ;;  %v2307_v59 = vadd.f32 %v3367_v7, %v2051_v57 }
 0x222   :  { %v1546_v60 = vpop.permute.xlu1 %1545  ;;  %v1539_v61 = vpop.permute.xlu0 %1538 }
 0x223   :  { %2564 = vst [vmem:[#allocation2 + $0x698] sm:$0xff] %v2308_v58  ;;  %2563 = vst [vmem:[#allocation2 + $0x690] sm:$0xff] %v2307_v59  ;;  %v2054_v62 = vmul.f32 %v3374_v49, %v1546_v60  ;;  %v2053_v5 = vmul.f32 %v3374_v49, %v1539_v61 }
 0x225   :  { %v2310_v3 = vadd.f32 %v3367_v7, %v2054_v62  ;;  %v2309_v63 = vadd.f32 %v3367_v7, %v2053_v5 }
 0x226   :  { %v1560_v0 = vpop.permute.xlu1 %1559  ;;  %v1553_v1 = vpop.permute.xlu0 %1552 }
 0x227   :  { %2566 = vst [vmem:[#allocation2 + $0x6a8] sm:$0xff] %v2310_v3  ;;  %2565 = vst [vmem:[#allocation2 + $0x6a0] sm:$0xff] %v2309_v63  ;;  %v2056_v2 = vmul.f32 %v3374_v49, %v1560_v0  ;;  %v2055_v45 = vmul.f32 %v3374_v49, %v1553_v1 }
 0x229   :  { %v2312_v8 = vadd.f32 %v3367_v7, %v2056_v2  ;;  %v2311_v11 = vadd.f32 %v3367_v7, %v2055_v45 }
 0x22a   :  { %v1574_v12 = vpop.permute.xlu1 %1573  ;;  %v1567_v9 = vpop.permute.xlu0 %1566 }
 0x22b   :  { %2568 = vst [vmem:[#allocation2 + $0x6b8] sm:$0xff] %v2312_v8  ;;  %2567 = vst [vmem:[#allocation2 + $0x6b0] sm:$0xff] %v2311_v11  ;;  %v2058_v10 = vmul.f32 %v3374_v49, %v1574_v12  ;;  %v2057_v13 = vmul.f32 %v3374_v49, %v1567_v9 }
 0x22d   :  { %v2314_v14 = vadd.f32 %v3367_v7, %v2058_v10  ;;  %v2313_v17 = vadd.f32 %v3367_v7, %v2057_v13 }
 0x22e   :  { %v1588_v18 = vpop.permute.xlu1 %1587  ;;  %v1581_v15 = vpop.permute.xlu0 %1580 }
 0x22f   :  { %2570 = vst [vmem:[#allocation2 + $0x6c8] sm:$0xff] %v2314_v14  ;;  %2569 = vst [vmem:[#allocation2 + $0x6c0] sm:$0xff] %v2313_v17  ;;  %v2060_v19 = vmul.f32 %v3374_v49, %v1588_v18  ;;  %v2059_v16 = vmul.f32 %v3374_v49, %v1581_v15 }
 0x231   :  { %v2316_v21 = vadd.f32 %v3367_v7, %v2060_v19  ;;  %v2315_v22 = vadd.f32 %v3367_v7, %v2059_v16 }
 0x232   :  { %v1602_v24 = vpop.permute.xlu1 %1601  ;;  %v1595_v25 = vpop.permute.xlu0 %1594 }
 0x233   :  { %2572 = vst [vmem:[#allocation2 + $0x6d8] sm:$0xff] %v2316_v21  ;;  %2571 = vst [vmem:[#allocation2 + $0x6d0] sm:$0xff] %v2315_v22  ;;  %v2062_v26 = vmul.f32 %v3374_v49, %v1602_v24  ;;  %v2061_v27 = vmul.f32 %v3374_v49, %v1595_v25 }
 0x235   :  { %v2318_v28 = vadd.f32 %v3367_v7, %v2062_v26  ;;  %v2317_v29 = vadd.f32 %v3367_v7, %v2061_v27 }
 0x236   :  { %v1616_v30 = vpop.permute.xlu1 %1615  ;;  %v1609_v31 = vpop.permute.xlu0 %1608 }
 0x237   :  { %2574 = vst [vmem:[#allocation2 + $0x6e8] sm:$0xff] %v2318_v28  ;;  %2573 = vst [vmem:[#allocation2 + $0x6e0] sm:$0xff] %v2317_v29  ;;  %v2064_v32 = vmul.f32 %v3374_v49, %v1616_v30  ;;  %v2063_v33 = vmul.f32 %v3374_v49, %v1609_v31 }
 0x239   :  { %v2320_v34 = vadd.f32 %v3367_v7, %v2064_v32  ;;  %v2319_v35 = vadd.f32 %v3367_v7, %v2063_v33 }
 0x23a   :  { %v1630_v36 = vpop.permute.xlu1 %1629  ;;  %v1623_v37 = vpop.permute.xlu0 %1622 }
 0x23b   :  { %2576 = vst [vmem:[#allocation2 + $0x6f8] sm:$0xff] %v2320_v34  ;;  %2575 = vst [vmem:[#allocation2 + $0x6f0] sm:$0xff] %v2319_v35  ;;  %v2066_v38 = vmul.f32 %v3374_v49, %v1630_v36  ;;  %v2065_v39 = vmul.f32 %v3374_v49, %v1623_v37 }
 0x23d   :  { %v2322_v40 = vadd.f32 %v3367_v7, %v2066_v38  ;;  %v2321_v41 = vadd.f32 %v3367_v7, %v2065_v39 }
 0x23e   :  { %v1644_v42 = vpop.permute.xlu1 %1643  ;;  %v1637_v43 = vpop.permute.xlu0 %1636 }
 0x23f   :  { %2578 = vst [vmem:[#allocation2 + $0x708] sm:$0xff] %v2322_v40  ;;  %2577 = vst [vmem:[#allocation2 + $0x700] sm:$0xff] %v2321_v41  ;;  %v2068_v44 = vmul.f32 %v3374_v49, %v1644_v42  ;;  %v2067_v46 = vmul.f32 %v3374_v49, %v1637_v43 }
 0x241   :  { %v2324_v47 = vadd.f32 %v3367_v7, %v2068_v44  ;;  %v2323_v20 = vadd.f32 %v3367_v7, %v2067_v46 }
 0x242   :  { %v1658_v48 = vpop.permute.xlu1 %1657  ;;  %v1651_v23 = vpop.permute.xlu0 %1650 }
 0x243   :  { %2580 = vst [vmem:[#allocation2 + $0x718] sm:$0xff] %v2324_v47  ;;  %2579 = vst [vmem:[#allocation2 + $0x710] sm:$0xff] %v2323_v20  ;;  %v2070_v50 = vmul.f32 %v3374_v49, %v1658_v48  ;;  %v2069_v51 = vmul.f32 %v3374_v49, %v1651_v23 }
 0x245   :  { %v2326_v52 = vadd.f32 %v3367_v7, %v2070_v50  ;;  %v2325_v53 = vadd.f32 %v3367_v7, %v2069_v51 }
 0x246   :  { %v1672_v54 = vpop.permute.xlu1 %1671  ;;  %v1665_v55 = vpop.permute.xlu0 %1664 }
 0x247   :  { %2582 = vst [vmem:[#allocation2 + $0x728] sm:$0xff] %v2326_v52  ;;  %2581 = vst [vmem:[#allocation2 + $0x720] sm:$0xff] %v2325_v53  ;;  %v2072_v56 = vmul.f32 %v3374_v49, %v1672_v54  ;;  %v2071_v6 = vmul.f32 %v3374_v49, %v1665_v55 }
 0x249   :  { %v2328_v4 = vadd.f32 %v3367_v7, %v2072_v56  ;;  %v2327_v57 = vadd.f32 %v3367_v7, %v2071_v6 }
 0x24a   :  { %v1686_v58 = vpop.permute.xlu1 %1685  ;;  %v1679_v59 = vpop.permute.xlu0 %1678 }
 0x24b   :  { %2584 = vst [vmem:[#allocation2 + $0x738] sm:$0xff] %v2328_v4  ;;  %2583 = vst [vmem:[#allocation2 + $0x730] sm:$0xff] %v2327_v57  ;;  %v2074_v60 = vmul.f32 %v3374_v49, %v1686_v58  ;;  %v2073_v61 = vmul.f32 %v3374_v49, %v1679_v59 }
 0x24d   :  { %v2330_v62 = vadd.f32 %v3367_v7, %v2074_v60  ;;  %v2329_v5 = vadd.f32 %v3367_v7, %v2073_v61 }
 0x24e   :  { %v1700_v3 = vpop.permute.xlu1 %1699  ;;  %v1693_v63 = vpop.permute.xlu0 %1692 }
 0x24f   :  { %2586 = vst [vmem:[#allocation2 + $0x748] sm:$0xff] %v2330_v62  ;;  %2585 = vst [vmem:[#allocation2 + $0x740] sm:$0xff] %v2329_v5  ;;  %v2076_v0 = vmul.f32 %v3374_v49, %v1700_v3  ;;  %v2075_v1 = vmul.f32 %v3374_v49, %v1693_v63 }
 0x251   :  { %v2332_v2 = vadd.f32 %v3367_v7, %v2076_v0  ;;  %v2331_v45 = vadd.f32 %v3367_v7, %v2075_v1 }
 0x252   :  { %v1714_v8 = vpop.permute.xlu1 %1713  ;;  %v1707_v11 = vpop.permute.xlu0 %1706 }
 0x253   :  { %2588 = vst [vmem:[#allocation2 + $0x758] sm:$0xff] %v2332_v2  ;;  %2587 = vst [vmem:[#allocation2 + $0x750] sm:$0xff] %v2331_v45  ;;  %v2078_v12 = vmul.f32 %v3374_v49, %v1714_v8  ;;  %v2077_v9 = vmul.f32 %v3374_v49, %v1707_v11 }
 0x255   :  { %v2334_v10 = vadd.f32 %v3367_v7, %v2078_v12  ;;  %v2333_v13 = vadd.f32 %v3367_v7, %v2077_v9 }
 0x256   :  { %v1728_v14 = vpop.permute.xlu1 %1727  ;;  %v1721_v17 = vpop.permute.xlu0 %1720 }
 0x257   :  { %2590 = vst [vmem:[#allocation2 + $0x768] sm:$0xff] %v2334_v10  ;;  %2589 = vst [vmem:[#allocation2 + $0x760] sm:$0xff] %v2333_v13  ;;  %v2080_v18 = vmul.f32 %v3374_v49, %v1728_v14  ;;  %v2079_v15 = vmul.f32 %v3374_v49, %v1721_v17 }
 0x259   :  { %v2336_v19 = vadd.f32 %v3367_v7, %v2080_v18  ;;  %v2335_v16 = vadd.f32 %v3367_v7, %v2079_v15 }
 0x25a   :  { %v1742_v21 = vpop.permute.xlu1 %1741  ;;  %v1735_v22 = vpop.permute.xlu0 %1734 }
 0x25b   :  { %2592 = vst [vmem:[#allocation2 + $0x778] sm:$0xff] %v2336_v19  ;;  %2591 = vst [vmem:[#allocation2 + $0x770] sm:$0xff] %v2335_v16  ;;  %v2082_v24 = vmul.f32 %v3374_v49, %v1742_v21  ;;  %v2081_v25 = vmul.f32 %v3374_v49, %v1735_v22 }
 0x25d   :  { %v2338_v26 = vadd.f32 %v3367_v7, %v2082_v24  ;;  %v2337_v27 = vadd.f32 %v3367_v7, %v2081_v25 }
 0x25e   :  { %v1756_v28 = vpop.permute.xlu1 %1755  ;;  %v1749_v29 = vpop.permute.xlu0 %1748 }
 0x25f   :  { %2594 = vst [vmem:[#allocation2 + $0x788] sm:$0xff] %v2338_v26  ;;  %2593 = vst [vmem:[#allocation2 + $0x780] sm:$0xff] %v2337_v27  ;;  %v2084_v30 = vmul.f32 %v3374_v49, %v1756_v28  ;;  %v2083_v31 = vmul.f32 %v3374_v49, %v1749_v29 }
 0x261   :  { %v2340_v32 = vadd.f32 %v3367_v7, %v2084_v30  ;;  %v2339_v33 = vadd.f32 %v3367_v7, %v2083_v31 }
 0x262   :  { %v1770_v34 = vpop.permute.xlu1 %1769  ;;  %v1763_v35 = vpop.permute.xlu0 %1762 }
 0x263   :  { %2596 = vst [vmem:[#allocation2 + $0x798] sm:$0xff] %v2340_v32  ;;  %2595 = vst [vmem:[#allocation2 + $0x790] sm:$0xff] %v2339_v33  ;;  %v2086_v36 = vmul.f32 %v3374_v49, %v1770_v34  ;;  %v2085_v37 = vmul.f32 %v3374_v49, %v1763_v35 }
 0x265   :  { %v2342_v38 = vadd.f32 %v3367_v7, %v2086_v36  ;;  %v2341_v39 = vadd.f32 %v3367_v7, %v2085_v37 }
 0x266   :  { %v1784_v40 = vpop.permute.xlu1 %1783  ;;  %v1777_v41 = vpop.permute.xlu0 %1776 }
 0x267   :  { %2598 = vst [vmem:[#allocation2 + $0x7a8] sm:$0xff] %v2342_v38  ;;  %2597 = vst [vmem:[#allocation2 + $0x7a0] sm:$0xff] %v2341_v39  ;;  %v2088_v42 = vmul.f32 %v3374_v49, %v1784_v40  ;;  %v2087_v43 = vmul.f32 %v3374_v49, %v1777_v41 }
 0x269   :  { %v2344_v44 = vadd.f32 %v3367_v7, %v2088_v42  ;;  %v2343_v46 = vadd.f32 %v3367_v7, %v2087_v43 }
 0x26a   :  { %v1798_v47 = vpop.permute.xlu1 %1797  ;;  %v1791_v20 = vpop.permute.xlu0 %1790 }
 0x26b   :  { %2600 = vst [vmem:[#allocation2 + $0x7b8] sm:$0xff] %v2344_v44  ;;  %2599 = vst [vmem:[#allocation2 + $0x7b0] sm:$0xff] %v2343_v46  ;;  %v2090_v48 = vmul.f32 %v3374_v49, %v1798_v47  ;;  %v2089_v23 = vmul.f32 %v3374_v49, %v1791_v20 }
 0x26d   :  { %v2346_v50 = vadd.f32 %v3367_v7, %v2090_v48  ;;  %v2345_v51 = vadd.f32 %v3367_v7, %v2089_v23 }
 0x26e   :  { %v1812_v52 = vpop.permute.xlu1 %1811  ;;  %v1805_v53 = vpop.permute.xlu0 %1804 }
 0x26f   :  { %2602 = vst [vmem:[#allocation2 + $0x7c8] sm:$0xff] %v2346_v50  ;;  %2601 = vst [vmem:[#allocation2 + $0x7c0] sm:$0xff] %v2345_v51  ;;  %v2092_v54 = vmul.f32 %v3374_v49, %v1812_v52  ;;  %v2091_v55 = vmul.f32 %v3374_v49, %v1805_v53 }
 0x271   :  { %v2348_v56 = vadd.f32 %v3367_v7, %v2092_v54  ;;  %v2347_v6 = vadd.f32 %v3367_v7, %v2091_v55 }
 0x272   :  { %v1826_v4 = vpop.permute.xlu1 %1825  ;;  %v1819_v57 = vpop.permute.xlu0 %1818 }
 0x273   :  { %2604 = vst [vmem:[#allocation2 + $0x7d8] sm:$0xff] %v2348_v56  ;;  %2603 = vst [vmem:[#allocation2 + $0x7d0] sm:$0xff] %v2347_v6  ;;  %v2094_v58 = vmul.f32 %v3374_v49, %v1826_v4  ;;  %v2093_v59 = vmul.f32 %v3374_v49, %v1819_v57 }
 0x275   :  { %v2350_v60 = vadd.f32 %v3367_v7, %v2094_v58  ;;  %v2349_v61 = vadd.f32 %v3367_v7, %v2093_v59 }
 0x276   :  { %v1840_v62 = vpop.permute.xlu1 %1839  ;;  %v1833_v5 = vpop.permute.xlu0 %1832 }
 0x277   :  { %2606 = vst [vmem:[#allocation2 + $0x7e8] sm:$0xff] %v2350_v60  ;;  %2605 = vst [vmem:[#allocation2 + $0x7e0] sm:$0xff] %v2349_v61  ;;  %v2096_v3 = vmul.f32 %v3374_v49, %v1840_v62  ;;  %v2095_v63 = vmul.f32 %v3374_v49, %v1833_v5 }
 0x279   :  { %v2352_v0 = vadd.f32 %v3367_v7, %v2096_v3  ;;  %v2351_v1 = vadd.f32 %v3367_v7, %v2095_v63 }
 0x27b   :  { %2608 = vst [vmem:[#allocation2 + $0x7f8] sm:$0xff] %v2352_v0  ;;  %2607 = vst [vmem:[#allocation2 + $0x7f0] sm:$0xff] %v2351_v1 }
 0x27c   :  { %2643 = shalt.err (!%p2640_p4)
}
 0x27d   :  { %s2644_s9 = scalar_lea.hbm %s3604_s3, 32768 }
 0x27e   :  { %p2645_p5 = scmp.ne.s32.totalorder %s3604_s3, %s2644_s9  ;;  %p2648_p6 = scmp.lt.u32.totalorder %s2644_s9, %s3604_s3 }
 0x280   :  { %p2650_p7 = pnand %p2648_p6, %p2645_p5 }
 0x282   :  { %2653 = shalt.err (!%p2650_p7)
}
 0x283   :  { %s2657_s14 = smov 128   ;;  %s2658_s15 = smov 8  }
 0x284   :  { %2620 = dma.vmem_to_hbm [thread:$0]  %s2615_s5, 32768, %s3604_s3, [#allocation3], %s2657_s14, %s2657_s14, %s2658_s15  }
 0x285   :  { %2654 = dma.done.wait [#allocation3], 32768  }
 0x286   :  { %2655 = vsyncadd [#allocation3], 4294934528 }
 0x287   :  { %2624 = vsyncpa [#allocation3], 1 }

</bundles_post_ra>
